<compile_context>
chip_gen: v6e
topology: v6e:2x2x1
jax: 0.10.0
libtpu: 0.0.40
codegen_flags: <defaults>
</compile_context>

<pallas_src>
import functools

import numpy as np
import jax
import jax.numpy as jnp
from jax.experimental import pallas as pl
from jax.experimental.pallas import tpu as pltpu


# ----------------------------- in-kernel helpers ---------------------------

def _mm(a, b):
    """a @ b with f32 MXU accumulation.  a: (M, K), b: (K, N)."""
    return jax.lax.dot_general(a, b, (((1,), (0,)), ((), ())),
                               preferred_element_type=jnp.float32)


def _mm_nt(a, b):
    """a @ b.T with f32 MXU accumulation.  a: (M, K), b: (N, K)."""
    return jax.lax.dot_general(a, b, (((1,), (1,)), ((), ())),
                               preferred_element_type=jnp.float32)


def _layer_norm(x, gamma, beta, eps=1e-5):
    mean = jnp.mean(x, axis=-1, keepdims=True)
    var = jnp.mean((x - mean) ** 2, axis=-1, keepdims=True)
    return (x - mean) * jax.lax.rsqrt(var + eps) * gamma + beta


def _attend(q_res, k_ref, v_ref, wq_t, bq, fcw_t, fcb, gamma, beta, npm,
            *, n_head, d_k, d_v, inv_temp, mask):
    """One MHA sub-block (+ residual, LayerNorm, non-pad mask) for a query
    tile, with K/V read from resident bf16 VMEM scratch.

    q_res : (TQ, D) f32       query tile (also the residual)
    k_ref : (LK, H*dk) bf16   VMEM scratch ref
    v_ref : (LK, H*dv) bf16   VMEM scratch ref
    fcw_t : (H*dv, D) bf16    output projection weight (transposed)
    """
    # Fused full-width Q projection (one MXU matmul), bias added once at full
    # width; 1/sqrt(d_k) folded into Q (cheaper than scaling (TQ, LK) scores).
    Q = (_mm(q_res.astype(jnp.bfloat16), wq_t) + bq) * inv_temp   # (TQ, H*dk) f32
    Q16 = Q.astype(jnp.bfloat16)

    heads = []
    for h in range(n_head):
        qh = Q16[:, h * d_k:(h + 1) * d_k]                        # (TQ, dk) bf16
        kh = k_ref[:, h * d_k:(h + 1) * d_k]                      # (LK, dk) bf16
        vh = v_ref[:, h * d_v:(h + 1) * d_v]                      # (LK, dv) bf16

        s = _mm_nt(qh, kh)                                        # (TQ, LK) f32
        if mask is not None:
            s = jnp.where(mask, -10000000000.0, s)
        m = jnp.max(s, axis=-1, keepdims=True)
        e = jnp.exp(s - m)
        denom = jnp.sum(e, axis=-1, keepdims=True)
        # Normalise AFTER the PV matmul: (TQ, dv) multiply, not (TQ, LK).
        ov = _mm(e.astype(jnp.bfloat16), vh)                      # (TQ, dv) f32
        ov = ov * pl.reciprocal(denom, approx=True)
        heads.append(ov.astype(jnp.bfloat16))

    cat = heads[0] if n_head == 1 else jnp.concatenate(heads, axis=-1)
    proj = _mm(cat, fcw_t)                                        # (TQ, D) f32
    return _layer_norm(proj + fcb + q_res, gamma, beta) * npm


# ------------------------- fused decoder-layer kernel ----------------------

def decoder_layer_kernel(
        dec_ref, enc_ref, np_ref,
        s_wq, s_bq, s_wk, s_bk, s_wv, s_bv, s_fcw, s_fcb, s_g, s_be,
        c_wq, c_bq, c_wk, c_bk, c_wv, c_bv, c_fcw, c_fcb, c_g, c_be,
        f_w1, f_b1, f_w2, f_b2, f_g, f_be,
        o_ref,
        sk_ref, sv_ref, ck_ref, cv_ref,
        *, n_head, d_k, d_v, tq, inv_temp):
    t = pl.program_id(1)
    q_start = pl.multiple_of(t * tq, tq)
    lq = dec_ref.shape[1]

    # K/V projections computed ONCE per batch row (at query-tile 0) and kept
    # resident in bf16 VMEM scratch across the "arbitrary" query-tile axis.
    @pl.when(t == 0)
    def _():
        dec16 = dec_ref[0].astype(jnp.bfloat16)                   # (Lq, D)
        enc16 = enc_ref[0].astype(jnp.bfloat16)                   # (Lk, D)
        sk_ref[...] = (_mm(dec16, s_wk[...]) + s_bk[...]).astype(jnp.bfloat16)
        sv_ref[...] = (_mm(dec16, s_wv[...]) + s_bv[...]).astype(jnp.bfloat16)
        ck_ref[...] = (_mm(enc16, c_wk[...]) + c_bk[...]).astype(jnp.bfloat16)
        cv_ref[...] = (_mm(enc16, c_wv[...]) + c_bv[...]).astype(jnp.bfloat16)

    # Query tile sliced out of the already-resident dec block (no extra DMA
    # stream for the query tile).
    q_in = dec_ref[0, pl.ds(q_start, tq), :].astype(jnp.float32)  # (TQ, D)
    npm = np_ref[0]                                               # (TQ, 1) f32

    # Causal mask built in-kernel from iota (no dense O(Lq*Lq) mask DMA).
    q_ids = q_start + jax.lax.broadcasted_iota(jnp.int32, (tq, lq), 0)
    k_ids = jax.lax.broadcasted_iota(jnp.int32, (tq, lq), 1)
    causal = k_ids > q_ids
    # TODO(synk): skip fully-masked causal KV chunks (flash-style inner loop
    # gated with pl.when) for a further ~2x self-attn saving at large Lq.

    # -- self attention (+ residual, LN, non-pad) --
    x = _attend(q_in, sk_ref, sv_ref, s_wq[...], s_bq[...], s_fcw[...],
                s_fcb[...], s_g[...], s_be[...], npm,
                n_head=n_head, d_k=d_k, d_v=d_v, inv_temp=inv_temp,
                mask=causal)

    # -- encoder-decoder attention (unmasked) --
    x = _attend(x, ck_ref, cv_ref, c_wq[...], c_bq[...], c_fcw[...],
                c_fcb[...], c_g[...], c_be[...], npm,
                n_head=n_head, d_k=d_k, d_v=d_v, inv_temp=inv_temp,
                mask=None)

    # -- position-wise FFN --
    hdn = jnp.maximum(_mm(x.astype(jnp.bfloat16), f_w1[...]) + f_b1[...], 0.0)
    y = _mm(hdn.astype(jnp.bfloat16), f_w2[...]) + f_b2[...]
    x = _layer_norm(y + x, f_g[...], f_be[...]) * npm

    o_ref[0] = x.astype(o_ref.dtype)


# ------------------------------ pallas wrapper ------------------------------

def _full_spec(shape):
    # Constant-index (grid-invariant) spec for weights.
    # TODO(synk): single-buffer these (pipeline_mode=pl.Buffered(1)) once
    # verified on the target jax version to halve the weight VMEM footprint.
    return pl.BlockSpec(shape, lambda b, t, _n=len(shape): (0,) * _n)


def _layer_cost_estimate(B, Lq, Lk, D, H, d_k, d_v, d_inner, w_bytes):
    def mm(m, k, n):
        return 2 * m * k * n
    flops = (
        # K/V projections (once per batch row, hoisted out of the q-tile axis)
        mm(Lq, D, H * d_k) + mm(Lq, D, H * d_v)
        + mm(Lk, D, H * d_k) + mm(Lk, D, H * d_v)
        # self attention
        + mm(Lq, D, H * d_k)
        + H * (mm(Lq, d_k, Lq) + mm(Lq, Lq, d_v)) + mm(Lq, H * d_v, D)
        # cross attention
        + mm(Lq, D, H * d_k)
        + H * (mm(Lq, d_k, Lk) + mm(Lq, Lk, d_v)) + mm(Lq, H * d_v, D)
        # FFN
        + mm(Lq, D, d_inner) + mm(Lq, d_inner, D))
    transcendentals = H * Lq * (Lq + Lk) + 8 * Lq
    act_bytes = 2 * (2 * Lq * D + Lk * D) + 4 * Lq   # bf16 acts + f32 non-pad
    return pl.CostEstimate(flops=int(B * flops),
                           transcendentals=int(B * transcendentals),
                           bytes_accessed=int(B * act_bytes + w_bytes))


def decoder_layer_forward(dec_inp, enc_out, non_pad, layer_params, *, tq=None):
    B, Lq, D = dec_inp.shape
    Lk = enc_out.shape[1]
    sa = layer_params["slf_attn"]
    ca = layer_params["enc_attn"]
    ff = layer_params["pos_ffn"]
    H, d_k, d_v = sa["n_head"], sa["d_k"], sa["d_v"]
    d_inner = ff["w1_t"].shape[1]

    if tq is None:
        # 256 fills the M dimension of v6e/v7x's 256-wide MXU; on v5e
        # (128-wide MXU) prefer passing tq=128 explicitly.
        tq = Lq if Lq <= 256 else 256
    assert Lq % tq == 0, "sequence length must be divisible by the query tile"
    n_qt = Lq // tq

    weights = [
        sa["wq_t"], sa["bq"], sa["wk_t"], sa["bk"], sa["wv_t"], sa["bv"],
        sa["fcw_t"], sa["fcb"], sa["gamma"], sa["beta"],
        ca["wq_t"], ca["bq"], ca["wk_t"], ca["bk"], ca["wv_t"], ca["bv"],
        ca["fcw_t"], ca["fcb"], ca["gamma"], ca["beta"],
        ff["w1_t"], ff["b1"], ff["w2_t"], ff["b2"], ff["gamma"], ff["beta"],
    ]

    # Explicit VMEM budget: double-buffered activation blocks, weights
    # (conservatively counted double-buffered), bf16 K/V scratch, + headroom.
    nbytes = lambda a: int(a.size) * a.dtype.itemsize
    blk_bytes = 2 * (Lq * D * 2 + Lk * D * 2 + tq * 4 + tq * D * 2)
    w_bytes = int(sum(nbytes(w) for w in weights))
    scratch_bytes = 2 * (Lq + Lk) * (H * d_k + H * d_v)
    vmem_limit = int(min(max(2 * (blk_bytes + 2 * w_bytes + scratch_bytes)
                             + (4 << 20), 32 << 20), 64 << 20))

    kernel = functools.partial(
        decoder_layer_kernel, n_head=H, d_k=d_k, d_v=d_v, tq=tq,
        inv_temp=float(1.0 / np.power(d_k, 0.5)))

    return pl.pallas_call(
        kernel,
        out_shape=jax.ShapeDtypeStruct((B, Lq, D), jnp.bfloat16),
        grid=(B, n_qt),
        in_specs=[
            pl.BlockSpec((1, Lq, D), lambda b, t: (b, 0, 0)),   # full dec block
            pl.BlockSpec((1, Lk, D), lambda b, t: (b, 0, 0)),   # encoder output
            pl.BlockSpec((1, tq, 1), lambda b, t: (b, t, 0)),   # non-pad tile
        ] + [_full_spec(w.shape) for w in weights],
        out_specs=pl.BlockSpec((1, tq, D), lambda b, t: (b, t, 0)),
        scratch_shapes=[
            pltpu.VMEM((Lq, H * d_k), jnp.bfloat16),   # self-attn K
            pltpu.VMEM((Lq, H * d_v), jnp.bfloat16),   # self-attn V
            pltpu.VMEM((Lk, H * d_k), jnp.bfloat16),   # cross-attn K
            pltpu.VMEM((Lk, H * d_v), jnp.bfloat16),   # cross-attn V
        ],
        compiler_params=pltpu.CompilerParams(
            dimension_semantics=("parallel", "arbitrary"),
            vmem_limit_bytes=vmem_limit),
        cost_estimate=_layer_cost_estimate(B, Lq, Lk, D, H, d_k, d_v, d_inner,
                                           w_bytes),
    )(dec_inp, enc_out, non_pad, *weights)


def decoder_forward(src_seq, tgt_seq, non_pad_mask, params, *, tq=None):
    # TODO(synk): arbitrary dense slf_attn_mask / dec_enc_attn_mask (e.g. key
    # padding) are not plumbed into the fused kernel; it generates the
    # standard causal self-attn mask in-kernel from iota and runs the
    # encoder-decoder attention unmasked (mask == all zeros).
    dec_output = tgt_seq.astype(jnp.bfloat16)   # bf16 inter-layer activations
    enc16 = src_seq.astype(jnp.bfloat16)
    for lp in params["kernel_layers"]:
        dec_output = decoder_layer_forward(dec_output, enc16, non_pad_mask,
                                           lp, tq=tq)
    return dec_output


# ------------------------- deterministic parameter init --------------------

def init_mha(key, n_head, d_model, d_k, d_v):
    ks = jax.random.split(key, 8)
    std_qk = float(np.sqrt(2.0 / (d_model + d_k)))
    std_v = float(np.sqrt(2.0 / (d_model + d_v)))
    std_fc = float(np.sqrt(2.0 / (n_head * d_v + d_model)))  # xavier_normal

    def lin_bias(k, n, fan_in):
        bnd = 1.0 / np.sqrt(fan_in)
        return jax.random.uniform(k, (1, n), jnp.float32, -bnd, bnd)

    return dict(
        n_head=n_head, d_k=d_k, d_v=d_v,
        wq=std_qk * jax.random.normal(ks[0], (n_head * d_k, d_model), jnp.float32),
        bq=lin_bias(ks[1], n_head * d_k, d_model),
        wk=std_qk * jax.random.normal(ks[2], (n_head * d_k, d_model), jnp.float32),
        bk=lin_bias(ks[3], n_head * d_k, d_model),
        wv=std_v * jax.random.normal(ks[4], (n_head * d_v, d_model), jnp.float32),
        bv=lin_bias(ks[5], n_head * d_v, d_model),
        fcw=std_fc * jax.random.normal(ks[6], (d_model, n_head * d_v), jnp.float32),
        fcb=lin_bias(ks[7], d_model, n_head * d_v),
        gamma=jnp.ones((1, d_model), jnp.float32),
        beta=jnp.zeros((1, d_model), jnp.float32),
    )


def init_ffn(key, d_model, d_inner):
    ks = jax.random.split(key, 4)
    b1 = 1.0 / np.sqrt(d_model)   # Conv1d(k=1) fan_in = d_model
    b2 = 1.0 / np.sqrt(d_inner)
    return dict(
        w1=jax.random.uniform(ks[0], (d_inner, d_model), jnp.float32, -b1, b1),
        b1=jax.random.uniform(ks[1], (1, d_inner), jnp.float32, -b1, b1),
        w2=jax.random.uniform(ks[2], (d_model, d_inner), jnp.float32, -b2, b2),
        b2=jax.random.uniform(ks[3], (1, d_model), jnp.float32, -b2, b2),
        gamma=jnp.ones((1, d_model), jnp.float32),
        beta=jnp.zeros((1, d_model), jnp.float32),
    )


# ---------------- kernel-side parameter layout (host-side, done once) ------

def prep_attn(p):
    H, d_k, d_v = p["n_head"], p["d_k"], p["d_v"]
    return dict(
        n_head=H, d_k=d_k, d_v=d_v,
        wq_t=p["wq"].T.astype(jnp.bfloat16),                 # (D, H*dk)
        wk_t=p["wk"].T.astype(jnp.bfloat16),                 # (D, H*dk)
        wv_t=p["wv"].T.astype(jnp.bfloat16),                 # (D, H*dv)
        bq=p["bq"], bk=p["bk"], bv=p["bv"],
        fcw_t=p["fcw"].T.astype(jnp.bfloat16),               # (H*dv, D)
        fcb=p["fcb"], gamma=p["gamma"], beta=p["beta"],
    )


def prep_ffn(p):
    return dict(
        w1_t=p["w1"].T.astype(jnp.bfloat16),                 # (D, d_inner)
        b1=p["b1"],
        w2_t=p["w2"].T.astype(jnp.bfloat16),                 # (d_inner, D)
        b2=p["b2"],
        gamma=p["gamma"], beta=p["beta"],
    )


def prepare_params(raw_layers):
    return [dict(slf_attn=prep_attn(l["slf_attn"]),
                 enc_attn=prep_attn(l["enc_attn"]),
                 pos_ffn=prep_ffn(l["pos_ffn"])) for l in raw_layers]


# ------------------------------- pure-JAX reference ------------------------

def _ln_ref(x, g, b, eps=1e-5):
    m = x.mean(-1, keepdims=True)
    v = ((x - m) ** 2).mean(-1, keepdims=True)
    return (x - m) / jnp.sqrt(v + eps) * g + b


def mha_ref(q, kv, mask, non_pad, p):
    H, dk, dv = p["n_head"], p["d_k"], p["d_v"]
    B, Lq, D = q.shape
    Lk = kv.shape[1]
    Q = (q @ p["wq"].T + p["bq"]).reshape(B, Lq, H, dk).transpose(0, 2, 1, 3)
    K = (kv @ p["wk"].T + p["bk"]).reshape(B, Lk, H, dk).transpose(0, 2, 1, 3)
    V = (kv @ p["wv"].T + p["bv"]).reshape(B, Lk, H, dv).transpose(0, 2, 1, 3)
    s = jnp.einsum("bhqd,bhkd->bhqk", Q, K) / np.power(dk, 0.5)
    s = jnp.where(mask[:, None] > 0.0, -10000000000.0, s)
    a = jax.nn.softmax(s, axis=-1)
    o = jnp.einsum("bhqk,bhkd->bhqd", a, V).transpose(0, 2, 1, 3).reshape(B, Lq, H * dv)
    o = o @ p["fcw"].T + p["fcb"]
    return _ln_ref(o + q, p["gamma"], p["beta"]) * non_pad


def ffn_ref(x, non_pad, p):
    h = jnp.maximum(x @ p["w1"].T + p["b1"], 0.0)
    y = h @ p["w2"].T + p["b2"]
    return _ln_ref(y + x, p["gamma"], p["beta"]) * non_pad


def decoder_ref(src_seq, tgt_seq, non_pad_mask, slf_attn_mask,
                dec_enc_attn_mask, params):
    out = tgt_seq
    for lp in params["layers"]:
        out = mha_ref(out, out, slf_attn_mask, non_pad_mask, lp["slf_attn"])
        out = mha_ref(out, src_seq, dec_enc_attn_mask, non_pad_mask, lp["enc_attn"])
        out = ffn_ref(out, non_pad_mask, lp["pos_ffn"])
    return out


# ------------------------------------ main ---------------------------------

if __name__ == "__main__":
    B, Lq, Lk = 2, 32, 8
    d_model, d_inner = 32, 64
    n_head, d_k, d_v, n_layers = 2, 16, 16, 2
    tq = 16   # query tile -> grid = (B, Lq // tq) = (2, 2)

    key = jax.random.PRNGKey(0)
    k_params, k_src, k_tgt = jax.random.split(key, 3)

    raw_layers = []
    kp = k_params
    for _ in range(n_layers):
        kp, k1, k2, k3 = jax.random.split(kp, 4)
        raw_layers.append(dict(
            slf_attn=init_mha(k1, n_head, d_model, d_k, d_v),
            enc_attn=init_mha(k2, n_head, d_model, d_k, d_v),
            pos_ffn=init_ffn(k3, d_model, d_inner),
        ))
    params = dict(raw_layers=raw_layers,
                  kernel_layers=prepare_params(raw_layers))

    src_seq = jax.random.normal(k_src, (B, Lk, d_model), jnp.float32)
    tgt_seq = jax.random.normal(k_tgt, (B, Lq, d_model), jnp.float32)

    # dense masks for the reference only (the kernel builds the causal mask
    # in-kernel from iota and assumes no encoder-decoder mask)
    causal = (jnp.arange(Lq)[:, None] < jnp.arange(Lq)[None, :]).astype(jnp.float32)
    slf_attn_mask = jnp.broadcast_to(causal, (B, Lq, Lq))
    dec_enc_attn_mask = jnp.zeros((B, Lq, Lk), jnp.float32)
    non_pad_mask = jnp.ones((B, Lq, 1), jnp.float32).at[:, -3:, :].set(0.0)

    out = decoder_forward(src_seq, tgt_seq, non_pad_mask, params, tq=tq)
    out = jax.block_until_ready(out)

    ref = decoder_ref(src_seq, tgt_seq, non_pad_mask, slf_attn_mask,
                      dec_enc_attn_mask, dict(layers=raw_layers))
    # bf16 MXU operands / bf16 inter-layer activations (f32 accumulation and
    # f32 LN / softmax statistics) + approx reciprocal => loosened tolerance
    # vs. the pure-f32 reference.
    out_f32 = np.asarray(jnp.asarray(out, jnp.float32))
    np.testing.assert_allclose(out_f32, np.asarray(ref), rtol=7.5e-2, atol=7.5e-2)

    # TODO(synk): dropout layers are intentionally identity (eval-mode / p=0).
    print("KERNEL_OK")
</pallas_src>

<mosaic_0001>
module attributes {stable_mosaic.version = 11 : i64} {
  func.func @decoder_layer_kernel(%arg0: i32, %arg1: i32, %arg2: memref<1x32x32xbf16, #tpu.memory_space<vmem>>, %arg3: memref<1x8x32xbf16, #tpu.memory_space<vmem>>, %arg4: memref<1x16x1xf32, #tpu.memory_space<vmem>>, %arg5: memref<32x32xbf16, #tpu.memory_space<vmem>>, %arg6: memref<1x32xf32, #tpu.memory_space<vmem>>, %arg7: memref<32x32xbf16, #tpu.memory_space<vmem>>, %arg8: memref<1x32xf32, #tpu.memory_space<vmem>>, %arg9: memref<32x32xbf16, #tpu.memory_space<vmem>>, %arg10: memref<1x32xf32, #tpu.memory_space<vmem>>, %arg11: memref<32x32xbf16, #tpu.memory_space<vmem>>, %arg12: memref<1x32xf32, #tpu.memory_space<vmem>>, %arg13: memref<1x32xf32, #tpu.memory_space<vmem>>, %arg14: memref<1x32xf32, #tpu.memory_space<vmem>>, %arg15: memref<32x32xbf16, #tpu.memory_space<vmem>>, %arg16: memref<1x32xf32, #tpu.memory_space<vmem>>, %arg17: memref<32x32xbf16, #tpu.memory_space<vmem>>, %arg18: memref<1x32xf32, #tpu.memory_space<vmem>>, %arg19: memref<32x32xbf16, #tpu.memory_space<vmem>>, %arg20: memref<1x32xf32, #tpu.memory_space<vmem>>, %arg21: memref<32x32xbf16, #tpu.memory_space<vmem>>, %arg22: memref<1x32xf32, #tpu.memory_space<vmem>>, %arg23: memref<1x32xf32, #tpu.memory_space<vmem>>, %arg24: memref<1x32xf32, #tpu.memory_space<vmem>>, %arg25: memref<32x64xbf16, #tpu.memory_space<vmem>>, %arg26: memref<1x64xf32, #tpu.memory_space<vmem>>, %arg27: memref<64x32xbf16, #tpu.memory_space<vmem>>, %arg28: memref<1x32xf32, #tpu.memory_space<vmem>>, %arg29: memref<1x32xf32, #tpu.memory_space<vmem>>, %arg30: memref<1x32xf32, #tpu.memory_space<vmem>>, %arg31: memref<1x16x32xbf16, #tpu.memory_space<vmem>>, %arg32: memref<32x32xbf16, #tpu.memory_space<vmem>>, %arg33: memref<32x32xbf16, #tpu.memory_space<vmem>>, %arg34: memref<8x32xbf16, #tpu.memory_space<vmem>>, %arg35: memref<8x32xbf16, #tpu.memory_space<vmem>>) attributes {dimension_semantics = [#tpu.dimension_semantics<parallel>, #tpu.dimension_semantics<arbitrary>], iteration_bounds = array<i64: 2, 2>, scalar_prefetch = 0 : i64, scratch_operands = 4 : i64, tpu.core_type = #tpu.core_type<tc>, window_params = [{transform_indices = @transform_0, window_bounds = array<i64: 1, 32, 32>}, {transform_indices = @transform_1, window_bounds = array<i64: 1, 8, 32>}, {transform_indices = @transform_2, window_bounds = array<i64: 1, 16, 1>}, {pipeline_mode = #tpu.pipeline_mode<synchronous>, transform_indices = @transform_3, window_bounds = array<i64: 32, 32>}, {pipeline_mode = #tpu.pipeline_mode<synchronous>, transform_indices = @transform_4, window_bounds = array<i64: 1, 32>}, {pipeline_mode = #tpu.pipeline_mode<synchronous>, transform_indices = @transform_5, window_bounds = array<i64: 32, 32>}, {pipeline_mode = #tpu.pipeline_mode<synchronous>, transform_indices = @transform_6, window_bounds = array<i64: 1, 32>}, {pipeline_mode = #tpu.pipeline_mode<synchronous>, transform_indices = @transform_7, window_bounds = array<i64: 32, 32>}, {pipeline_mode = #tpu.pipeline_mode<synchronous>, transform_indices = @transform_8, window_bounds = array<i64: 1, 32>}, {pipeline_mode = #tpu.pipeline_mode<synchronous>, transform_indices = @transform_9, window_bounds = array<i64: 32, 32>}, {pipeline_mode = #tpu.pipeline_mode<synchronous>, transform_indices = @transform_10, window_bounds = array<i64: 1, 32>}, {pipeline_mode = #tpu.pipeline_mode<synchronous>, transform_indices = @transform_11, window_bounds = array<i64: 1, 32>}, {pipeline_mode = #tpu.pipeline_mode<synchronous>, transform_indices = @transform_12, window_bounds = array<i64: 1, 32>}, {pipeline_mode = #tpu.pipeline_mode<synchronous>, transform_indices = @transform_13, window_bounds = array<i64: 32, 32>}, {pipeline_mode = #tpu.pipeline_mode<synchronous>, transform_indices = @transform_14, window_bounds = array<i64: 1, 32>}, {pipeline_mode = #tpu.pipeline_mode<synchronous>, transform_indices = @transform_15, window_bounds = array<i64: 32, 32>}, {pipeline_mode = #tpu.pipeline_mode<synchronous>, transform_indices = @transform_16, window_bounds = array<i64: 1, 32>}, {pipeline_mode = #tpu.pipeline_mode<synchronous>, transform_indices = @transform_17, window_bounds = array<i64: 32, 32>}, {pipeline_mode = #tpu.pipeline_mode<synchronous>, transform_indices = @transform_18, window_bounds = array<i64: 1, 32>}, {pipeline_mode = #tpu.pipeline_mode<synchronous>, transform_indices = @transform_19, window_bounds = array<i64: 32, 32>}, {pipeline_mode = #tpu.pipeline_mode<synchronous>, transform_indices = @transform_20, window_bounds = array<i64: 1, 32>}, {pipeline_mode = #tpu.pipeline_mode<synchronous>, transform_indices = @transform_21, window_bounds = array<i64: 1, 32>}, {pipeline_mode = #tpu.pipeline_mode<synchronous>, transform_indices = @transform_22, window_bounds = array<i64: 1, 32>}, {pipeline_mode = #tpu.pipeline_mode<synchronous>, transform_indices = @transform_23, window_bounds = array<i64: 32, 64>}, {pipeline_mode = #tpu.pipeline_mode<synchronous>, transform_indices = @transform_24, window_bounds = array<i64: 1, 64>}, {pipeline_mode = #tpu.pipeline_mode<synchronous>, transform_indices = @transform_25, window_bounds = array<i64: 64, 32>}, {pipeline_mode = #tpu.pipeline_mode<synchronous>, transform_indices = @transform_26, window_bounds = array<i64: 1, 32>}, {pipeline_mode = #tpu.pipeline_mode<synchronous>, transform_indices = @transform_27, window_bounds = array<i64: 1, 32>}, {pipeline_mode = #tpu.pipeline_mode<synchronous>, transform_indices = @transform_28, window_bounds = array<i64: 1, 32>}, {transform_indices = @transform_29, window_bounds = array<i64: 1, 16, 32>}]} {
    %c16_i32 = arith.constant 16 : i32
    %0 = arith.muli %arg1, %c16_i32 : i32
    %1 = tpu.assume_multiple %0, 16 : i32
    %c0_i32 = arith.constant 0 : i32
    %2 = arith.cmpi eq, %arg1, %c0_i32 : i32
    %3 = arith.extui %2 : i1 to i32
    %c0_i32_0 = arith.constant 0 : i32
    %4 = arith.cmpi ne, %3, %c0_i32_0 : i32
    scf.if %4 {
      %c0_100 = arith.constant 0 : index
      %c0_101 = arith.constant 0 : index
      %c0_102 = arith.constant 0 : index
      %217 = vector.load %arg2[%c0_100, %c0_101, %c0_102] : memref<1x32x32xbf16, #tpu.memory_space<vmem>>, vector<1x32x32xbf16>
      %218 = vector.shape_cast %217 : vector<1x32x32xbf16> to vector<32x32xbf16>
      %c0_103 = arith.constant 0 : index
      %c0_104 = arith.constant 0 : index
      %c0_105 = arith.constant 0 : index
      %219 = vector.load %arg3[%c0_103, %c0_104, %c0_105] : memref<1x8x32xbf16, #tpu.memory_space<vmem>>, vector<1x8x32xbf16>
      %220 = vector.shape_cast %219 : vector<1x8x32xbf16> to vector<8x32xbf16>
      %c0_106 = arith.constant 0 : index
      %c0_107 = arith.constant 0 : index
      %221 = vector.load %arg7[%c0_106, %c0_107] : memref<32x32xbf16, #tpu.memory_space<vmem>>, vector<32x32xbf16>
      %cst_108 = arith.constant dense<0.000000e+00> : vector<32x32xf32>
      %222 = tpu.matmul %218, %221, %cst_108 {dimension_numbers = #tpu.dot_dimension_numbers<[1], [0], [0], [1], [0, 0, 1, 1], [], []>} : vector<32x32xbf16>, vector<32x32xbf16>, vector<32x32xf32> -> vector<32x32xf32>
      %c0_109 = arith.constant 0 : index
      %c0_110 = arith.constant 0 : index
      %223 = vector.load %arg8[%c0_109, %c0_110] : memref<1x32xf32, #tpu.memory_space<vmem>>, vector<1x32xf32>
      %224 = vector.broadcast %223 : vector<1x32xf32> to vector<32x32xf32>
      %225 = arith.addf %222, %224 : vector<32x32xf32>
      %226 = arith.truncf %225 : vector<32x32xf32> to vector<32x32xbf16>
      %c0_111 = arith.constant 0 : index
      %c0_112 = arith.constant 0 : index
      %227 = vector.load %arg32[%c0_111, %c0_112] : memref<32x32xbf16, #tpu.memory_space<vmem>>, vector<32x32xbf16>
      tpu.vector_store %arg32[%c0_111, %c0_112], %226 {strides = array<i32>} : memref<32x32xbf16, #tpu.memory_space<vmem>>, vector<32x32xbf16>,
      %c0_113 = arith.constant 0 : index
      %c0_114 = arith.constant 0 : index
      %228 = vector.load %arg9[%c0_113, %c0_114] : memref<32x32xbf16, #tpu.memory_space<vmem>>, vector<32x32xbf16>
      %cst_115 = arith.constant dense<0.000000e+00> : vector<32x32xf32>
      %229 = tpu.matmul %218, %228, %cst_115 {dimension_numbers = #tpu.dot_dimension_numbers<[1], [0], [0], [1], [0, 0, 1, 1], [], []>} : vector<32x32xbf16>, vector<32x32xbf16>, vector<32x32xf32> -> vector<32x32xf32>
      %c0_116 = arith.constant 0 : index
      %c0_117 = arith.constant 0 : index
      %230 = vector.load %arg10[%c0_116, %c0_117] : memref<1x32xf32, #tpu.memory_space<vmem>>, vector<1x32xf32>
      %231 = vector.broadcast %230 : vector<1x32xf32> to vector<32x32xf32>
      %232 = arith.addf %229, %231 : vector<32x32xf32>
      %233 = arith.truncf %232 : vector<32x32xf32> to vector<32x32xbf16>
      %c0_118 = arith.constant 0 : index
      %c0_119 = arith.constant 0 : index
      %234 = vector.load %arg33[%c0_118, %c0_119] : memref<32x32xbf16, #tpu.memory_space<vmem>>, vector<32x32xbf16>
      tpu.vector_store %arg33[%c0_118, %c0_119], %233 {strides = array<i32>} : memref<32x32xbf16, #tpu.memory_space<vmem>>, vector<32x32xbf16>,
      %c0_120 = arith.constant 0 : index
      %c0_121 = arith.constant 0 : index
      %235 = vector.load %arg17[%c0_120, %c0_121] : memref<32x32xbf16, #tpu.memory_space<vmem>>, vector<32x32xbf16>
      %cst_122 = arith.constant dense<0.000000e+00> : vector<8x32xf32>
      %236 = tpu.matmul %220, %235, %cst_122 {dimension_numbers = #tpu.dot_dimension_numbers<[1], [0], [0], [1], [0, 0, 1, 1], [], []>} : vector<8x32xbf16>, vector<32x32xbf16>, vector<8x32xf32> -> vector<8x32xf32>
      %c0_123 = arith.constant 0 : index
      %c0_124 = arith.constant 0 : index
      %237 = vector.load %arg18[%c0_123, %c0_124] : memref<1x32xf32, #tpu.memory_space<vmem>>, vector<1x32xf32>
      %238 = vector.broadcast %237 : vector<1x32xf32> to vector<8x32xf32>
      %239 = arith.addf %236, %238 : vector<8x32xf32>
      %240 = arith.truncf %239 : vector<8x32xf32> to vector<8x32xbf16>
      %c0_125 = arith.constant 0 : index
      %c0_126 = arith.constant 0 : index
      %241 = vector.load %arg34[%c0_125, %c0_126] : memref<8x32xbf16, #tpu.memory_space<vmem>>, vector<8x32xbf16>
      tpu.vector_store %arg34[%c0_125, %c0_126], %240 {strides = array<i32>} : memref<8x32xbf16, #tpu.memory_space<vmem>>, vector<8x32xbf16>,
      %c0_127 = arith.constant 0 : index
      %c0_128 = arith.constant 0 : index
      %242 = vector.load %arg19[%c0_127, %c0_128] : memref<32x32xbf16, #tpu.memory_space<vmem>>, vector<32x32xbf16>
      %cst_129 = arith.constant dense<0.000000e+00> : vector<8x32xf32>
      %243 = tpu.matmul %220, %242, %cst_129 {dimension_numbers = #tpu.dot_dimension_numbers<[1], [0], [0], [1], [0, 0, 1, 1], [], []>} : vector<8x32xbf16>, vector<32x32xbf16>, vector<8x32xf32> -> vector<8x32xf32>
      %c0_130 = arith.constant 0 : index
      %c0_131 = arith.constant 0 : index
      %244 = vector.load %arg20[%c0_130, %c0_131] : memref<1x32xf32, #tpu.memory_space<vmem>>, vector<1x32xf32>
      %245 = vector.broadcast %244 : vector<1x32xf32> to vector<8x32xf32>
      %246 = arith.addf %243, %245 : vector<8x32xf32>
      %247 = arith.truncf %246 : vector<8x32xf32> to vector<8x32xbf16>
      %c0_132 = arith.constant 0 : index
      %c0_133 = arith.constant 0 : index
      %248 = vector.load %arg35[%c0_132, %c0_133] : memref<8x32xbf16, #tpu.memory_space<vmem>>, vector<8x32xbf16>
      tpu.vector_store %arg35[%c0_132, %c0_133], %247 {strides = array<i32>} : memref<8x32xbf16, #tpu.memory_space<vmem>>, vector<8x32xbf16>,
    } else {
    }
    %c0 = arith.constant 0 : index
    %5 = arith.index_cast %1 : i32 to index
    %c0_1 = arith.constant 0 : index
    %6 = vector.load %arg2[%c0, %5, %c0_1] : memref<1x32x32xbf16, #tpu.memory_space<vmem>>, vector<1x16x32xbf16>
    %7 = vector.shape_cast %6 : vector<1x16x32xbf16> to vector<16x32xbf16>
    %8 = arith.extf %7 : vector<16x32xbf16> to vector<16x32xf32>
    %c0_2 = arith.constant 0 : index
    %c0_3 = arith.constant 0 : index
    %c0_4 = arith.constant 0 : index
    %9 = vector.load %arg4[%c0_2, %c0_3, %c0_4] : memref<1x16x1xf32, #tpu.memory_space<vmem>>, vector<1x16x1xf32>
    %10 = vector.shape_cast %9 : vector<1x16x1xf32> to vector<16x1xf32>
    %11 = tpu.iota {dimensions = array<i32: 0>} : vector<16x32xi32>
    %12 = vector.broadcast %1 : i32 to vector<16x32xi32>
    %13 = arith.addi %12, %11 : vector<16x32xi32>
    %14 = tpu.iota {dimensions = array<i32: 1>} : vector<16x32xi32>
    %15 = arith.cmpi sgt, %14, %13 : vector<16x32xi32>
    %c0_5 = arith.constant 0 : index
    %c0_6 = arith.constant 0 : index
    %16 = vector.load %arg5[%c0_5, %c0_6] : memref<32x32xbf16, #tpu.memory_space<vmem>>, vector<32x32xbf16>
    %c0_7 = arith.constant 0 : index
    %c0_8 = arith.constant 0 : index
    %17 = vector.load %arg6[%c0_7, %c0_8] : memref<1x32xf32, #tpu.memory_space<vmem>>, vector<1x32xf32>
    %c0_9 = arith.constant 0 : index
    %c0_10 = arith.constant 0 : index
    %18 = vector.load %arg11[%c0_9, %c0_10] : memref<32x32xbf16, #tpu.memory_space<vmem>>, vector<32x32xbf16>
    %c0_11 = arith.constant 0 : index
    %c0_12 = arith.constant 0 : index
    %19 = vector.load %arg12[%c0_11, %c0_12] : memref<1x32xf32, #tpu.memory_space<vmem>>, vector<1x32xf32>
    %c0_13 = arith.constant 0 : index
    %c0_14 = arith.constant 0 : index
    %20 = vector.load %arg13[%c0_13, %c0_14] : memref<1x32xf32, #tpu.memory_space<vmem>>, vector<1x32xf32>
    %c0_15 = arith.constant 0 : index
    %c0_16 = arith.constant 0 : index
    %21 = vector.load %arg14[%c0_15, %c0_16] : memref<1x32xf32, #tpu.memory_space<vmem>>, vector<1x32xf32>
    %22 = arith.truncf %8 : vector<16x32xf32> to vector<16x32xbf16>
    %cst = arith.constant dense<0.000000e+00> : vector<16x32xf32>
    %23 = tpu.matmul %22, %16, %cst {dimension_numbers = #tpu.dot_dimension_numbers<[1], [0], [0], [1], [0, 0, 1, 1], [], []>} : vector<16x32xbf16>, vector<32x32xbf16>, vector<16x32xf32> -> vector<16x32xf32>
    %24 = vector.broadcast %17 : vector<1x32xf32> to vector<16x32xf32>
    %25 = arith.addf %23, %24 : vector<16x32xf32>
    %cst_17 = arith.constant 2.500000e-01 : f32
    %26 = vector.broadcast %cst_17 : f32 to vector<16x32xf32>
    %27 = arith.mulf %25, %26 : vector<16x32xf32>
    %28 = arith.truncf %27 : vector<16x32xf32> to vector<16x32xbf16>
    %29 = vector.extract_strided_slice %28 {offsets = [0, 0], sizes = [16, 16], strides = [1, 1]} : vector<16x32xbf16> to vector<16x16xbf16>
    %c0_18 = arith.constant 0 : index
    %c0_19 = arith.constant 0 : index
    %30 = vector.load %arg32[%c0_18, %c0_19] : memref<32x32xbf16, #tpu.memory_space<vmem>>, vector<32x16xbf16>
    %c0_20 = arith.constant 0 : index
    %c0_21 = arith.constant 0 : index
    %31 = vector.load %arg33[%c0_20, %c0_21] : memref<32x32xbf16, #tpu.memory_space<vmem>>, vector<32x16xbf16>
    %cst_22 = arith.constant dense<0.000000e+00> : vector<16x32xf32>
    %32 = tpu.matmul %29, %30, %cst_22 {dimension_numbers = #tpu.dot_dimension_numbers<[1], [1], [0], [0], [0, 0, 1, 0], [], []>} : vector<16x16xbf16>, vector<32x16xbf16>, vector<16x32xf32> -> vector<16x32xf32>
    %cst_23 = arith.constant -1.000000e+10 : f32
    %33 = vector.broadcast %cst_23 : f32 to vector<16x32xf32>
    %34 = arith.select %15, %33, %32 : vector<16x32xi1>, vector<16x32xf32>
    %cst_24 = arith.constant dense<0xFF800000> : vector<16xf32>
    %35 = vector.multi_reduction <maximumf>, %34, %cst_24 [1] : vector<16x32xf32> to vector<16xf32>
    %36 = vector.shape_cast %35 : vector<16xf32> to vector<16x1xf32>
    %37 = vector.broadcast %36 : vector<16x1xf32> to vector<16x32xf32>
    %38 = arith.subf %34, %37 : vector<16x32xf32>
    %39 = math.exp %38 : vector<16x32xf32>
    %cst_25 = arith.constant dense<0.000000e+00> : vector<16xf32>
    %40 = vector.multi_reduction <add>, %39, %cst_25 [1] : vector<16x32xf32> to vector<16xf32>
    %41 = vector.shape_cast %40 : vector<16xf32> to vector<16x1xf32>
    %42 = arith.truncf %39 : vector<16x32xf32> to vector<16x32xbf16>
    %cst_26 = arith.constant dense<0.000000e+00> : vector<16x16xf32>
    %43 = tpu.matmul %42, %31, %cst_26 {dimension_numbers = #tpu.dot_dimension_numbers<[1], [0], [0], [1], [0, 0, 1, 1], [], []>} : vector<16x32xbf16>, vector<32x16xbf16>, vector<16x16xf32> -> vector<16x16xf32>
    %44 = tpu.reciprocal %41 {approx = true} : vector<16x1xf32> -> vector<16x1xf32>
    %45 = vector.broadcast %44 : vector<16x1xf32> to vector<16x16xf32>
    %46 = arith.mulf %43, %45 : vector<16x16xf32>
    %47 = arith.truncf %46 : vector<16x16xf32> to vector<16x16xbf16>
    %48 = vector.extract_strided_slice %28 {offsets = [0, 16], sizes = [16, 16], strides = [1, 1]} : vector<16x32xbf16> to vector<16x16xbf16>
    %c0_27 = arith.constant 0 : index
    %c16 = arith.constant 16 : index
    %49 = vector.load %arg32[%c0_27, %c16] : memref<32x32xbf16, #tpu.memory_space<vmem>>, vector<32x16xbf16>
    %c0_28 = arith.constant 0 : index
    %c16_29 = arith.constant 16 : index
    %50 = vector.load %arg33[%c0_28, %c16_29] : memref<32x32xbf16, #tpu.memory_space<vmem>>, vector<32x16xbf16>
    %cst_30 = arith.constant dense<0.000000e+00> : vector<16x32xf32>
    %51 = tpu.matmul %48, %49, %cst_30 {dimension_numbers = #tpu.dot_dimension_numbers<[1], [1], [0], [0], [0, 0, 1, 0], [], []>} : vector<16x16xbf16>, vector<32x16xbf16>, vector<16x32xf32> -> vector<16x32xf32>
    %cst_31 = arith.constant -1.000000e+10 : f32
    %52 = vector.broadcast %cst_31 : f32 to vector<16x32xf32>
    %53 = arith.select %15, %52, %51 : vector<16x32xi1>, vector<16x32xf32>
    %cst_32 = arith.constant dense<0xFF800000> : vector<16xf32>
    %54 = vector.multi_reduction <maximumf>, %53, %cst_32 [1] : vector<16x32xf32> to vector<16xf32>
    %55 = vector.shape_cast %54 : vector<16xf32> to vector<16x1xf32>
    %56 = vector.broadcast %55 : vector<16x1xf32> to vector<16x32xf32>
    %57 = arith.subf %53, %56 : vector<16x32xf32>
    %58 = math.exp %57 : vector<16x32xf32>
    %cst_33 = arith.constant dense<0.000000e+00> : vector<16xf32>
    %59 = vector.multi_reduction <add>, %58, %cst_33 [1] : vector<16x32xf32> to vector<16xf32>
    %60 = vector.shape_cast %59 : vector<16xf32> to vector<16x1xf32>
    %61 = arith.truncf %58 : vector<16x32xf32> to vector<16x32xbf16>
    %cst_34 = arith.constant dense<0.000000e+00> : vector<16x16xf32>
    %62 = tpu.matmul %61, %50, %cst_34 {dimension_numbers = #tpu.dot_dimension_numbers<[1], [0], [0], [1], [0, 0, 1, 1], [], []>} : vector<16x32xbf16>, vector<32x16xbf16>, vector<16x16xf32> -> vector<16x16xf32>
    %63 = tpu.reciprocal %60 {approx = true} : vector<16x1xf32> -> vector<16x1xf32>
    %64 = vector.broadcast %63 : vector<16x1xf32> to vector<16x16xf32>
    %65 = arith.mulf %62, %64 : vector<16x16xf32>
    %66 = arith.truncf %65 : vector<16x16xf32> to vector<16x16xbf16>
    %67 = tpu.concatenate %47, %66 in 1 : vector<16x16xbf16>, vector<16x16xbf16> -> vector<16x32xbf16>
    %cst_35 = arith.constant dense<0.000000e+00> : vector<16x32xf32>
    %68 = tpu.matmul %67, %18, %cst_35 {dimension_numbers = #tpu.dot_dimension_numbers<[1], [0], [0], [1], [0, 0, 1, 1], [], []>} : vector<16x32xbf16>, vector<32x32xbf16>, vector<16x32xf32> -> vector<16x32xf32>
    %69 = vector.broadcast %19 : vector<1x32xf32> to vector<16x32xf32>
    %70 = arith.addf %68, %69 : vector<16x32xf32>
    %71 = arith.addf %70, %8 : vector<16x32xf32>
    %cst_36 = arith.constant dense<0.000000e+00> : vector<16xf32>
    %72 = vector.multi_reduction <add>, %71, %cst_36 [1] : vector<16x32xf32> to vector<16xf32>
    %73 = vector.shape_cast %72 : vector<16xf32> to vector<16x1xf32>
    %cst_37 = arith.constant 3.200000e+01 : f32
    %74 = vector.broadcast %cst_37 : f32 to vector<16x1xf32>
    %75 = arith.divf %73, %74 : vector<16x1xf32>
    %76 = vector.broadcast %75 : vector<16x1xf32> to vector<16x32xf32>
    %77 = arith.subf %71, %76 : vector<16x32xf32>
    %78 = arith.mulf %77, %77 : vector<16x32xf32>
    %cst_38 = arith.constant dense<0.000000e+00> : vector<16xf32>
    %79 = vector.multi_reduction <add>, %78, %cst_38 [1] : vector<16x32xf32> to vector<16xf32>
    %80 = vector.shape_cast %79 : vector<16xf32> to vector<16x1xf32>
    %cst_39 = arith.constant 3.200000e+01 : f32
    %81 = vector.broadcast %cst_39 : f32 to vector<16x1xf32>
    %82 = arith.divf %80, %81 : vector<16x1xf32>
    %83 = vector.broadcast %75 : vector<16x1xf32> to vector<16x32xf32>
    %84 = arith.subf %71, %83 : vector<16x32xf32>
    %cst_40 = arith.constant 9.99999974E-6 : f32
    %85 = vector.broadcast %cst_40 : f32 to vector<16x1xf32>
    %86 = arith.addf %82, %85 : vector<16x1xf32>
    %87 = math.rsqrt %86 : vector<16x1xf32>
    %88 = vector.broadcast %87 : vector<16x1xf32> to vector<16x32xf32>
    %89 = arith.mulf %84, %88 : vector<16x32xf32>
    %90 = vector.broadcast %20 : vector<1x32xf32> to vector<16x32xf32>
    %91 = arith.mulf %89, %90 : vector<16x32xf32>
    %92 = vector.broadcast %21 : vector<1x32xf32> to vector<16x32xf32>
    %93 = arith.addf %91, %92 : vector<16x32xf32>
    %94 = vector.broadcast %10 : vector<16x1xf32> to vector<16x32xf32>
    %95 = arith.mulf %93, %94 : vector<16x32xf32>
    %c0_41 = arith.constant 0 : index
    %c0_42 = arith.constant 0 : index
    %96 = vector.load %arg15[%c0_41, %c0_42] : memref<32x32xbf16, #tpu.memory_space<vmem>>, vector<32x32xbf16>
    %c0_43 = arith.constant 0 : index
    %c0_44 = arith.constant 0 : index
    %97 = vector.load %arg16[%c0_43, %c0_44] : memref<1x32xf32, #tpu.memory_space<vmem>>, vector<1x32xf32>
    %c0_45 = arith.constant 0 : index
    %c0_46 = arith.constant 0 : index
    %98 = vector.load %arg21[%c0_45, %c0_46] : memref<32x32xbf16, #tpu.memory_space<vmem>>, vector<32x32xbf16>
    %c0_47 = arith.constant 0 : index
    %c0_48 = arith.constant 0 : index
    %99 = vector.load %arg22[%c0_47, %c0_48] : memref<1x32xf32, #tpu.memory_space<vmem>>, vector<1x32xf32>
    %c0_49 = arith.constant 0 : index
    %c0_50 = arith.constant 0 : index
    %100 = vector.load %arg23[%c0_49, %c0_50] : memref<1x32xf32, #tpu.memory_space<vmem>>, vector<1x32xf32>
    %c0_51 = arith.constant 0 : index
    %c0_52 = arith.constant 0 : index
    %101 = vector.load %arg24[%c0_51, %c0_52] : memref<1x32xf32, #tpu.memory_space<vmem>>, vector<1x32xf32>
    %102 = arith.truncf %95 : vector<16x32xf32> to vector<16x32xbf16>
    %cst_53 = arith.constant dense<0.000000e+00> : vector<16x32xf32>
    %103 = tpu.matmul %102, %96, %cst_53 {dimension_numbers = #tpu.dot_dimension_numbers<[1], [0], [0], [1], [0, 0, 1, 1], [], []>} : vector<16x32xbf16>, vector<32x32xbf16>, vector<16x32xf32> -> vector<16x32xf32>
    %104 = vector.broadcast %97 : vector<1x32xf32> to vector<16x32xf32>
    %105 = arith.addf %103, %104 : vector<16x32xf32>
    %cst_54 = arith.constant 2.500000e-01 : f32
    %106 = vector.broadcast %cst_54 : f32 to vector<16x32xf32>
    %107 = arith.mulf %105, %106 : vector<16x32xf32>
    %108 = arith.truncf %107 : vector<16x32xf32> to vector<16x32xbf16>
    %109 = vector.extract_strided_slice %108 {offsets = [0, 0], sizes = [16, 16], strides = [1, 1]} : vector<16x32xbf16> to vector<16x16xbf16>
    %c0_55 = arith.constant 0 : index
    %c0_56 = arith.constant 0 : index
    %110 = vector.load %arg34[%c0_55, %c0_56] : memref<8x32xbf16, #tpu.memory_space<vmem>>, vector<8x16xbf16>
    %c0_57 = arith.constant 0 : index
    %c0_58 = arith.constant 0 : index
    %111 = vector.load %arg35[%c0_57, %c0_58] : memref<8x32xbf16, #tpu.memory_space<vmem>>, vector<8x16xbf16>
    %cst_59 = arith.constant dense<0.000000e+00> : vector<16x8xf32>
    %112 = tpu.matmul %109, %110, %cst_59 {dimension_numbers = #tpu.dot_dimension_numbers<[1], [1], [0], [0], [0, 0, 1, 0], [], []>} : vector<16x16xbf16>, vector<8x16xbf16>, vector<16x8xf32> -> vector<16x8xf32>
    %cst_60 = arith.constant dense<0xFF800000> : vector<16xf32>
    %113 = vector.multi_reduction <maximumf>, %112, %cst_60 [1] : vector<16x8xf32> to vector<16xf32>
    %114 = vector.shape_cast %113 : vector<16xf32> to vector<16x1xf32>
    %115 = vector.broadcast %114 : vector<16x1xf32> to vector<16x8xf32>
    %116 = arith.subf %112, %115 : vector<16x8xf32>
    %117 = math.exp %116 : vector<16x8xf32>
    %cst_61 = arith.constant dense<0.000000e+00> : vector<16xf32>
    %118 = vector.multi_reduction <add>, %117, %cst_61 [1] : vector<16x8xf32> to vector<16xf32>
    %119 = vector.shape_cast %118 : vector<16xf32> to vector<16x1xf32>
    %120 = arith.truncf %117 : vector<16x8xf32> to vector<16x8xbf16>
    %cst_62 = arith.constant dense<0.000000e+00> : vector<16x16xf32>
    %121 = tpu.matmul %120, %111, %cst_62 {dimension_numbers = #tpu.dot_dimension_numbers<[1], [0], [0], [1], [0, 0, 1, 1], [], []>} : vector<16x8xbf16>, vector<8x16xbf16>, vector<16x16xf32> -> vector<16x16xf32>
    %122 = tpu.reciprocal %119 {approx = true} : vector<16x1xf32> -> vector<16x1xf32>
    %123 = vector.broadcast %122 : vector<16x1xf32> to vector<16x16xf32>
    %124 = arith.mulf %121, %123 : vector<16x16xf32>
    %125 = arith.truncf %124 : vector<16x16xf32> to vector<16x16xbf16>
    %126 = vector.extract_strided_slice %108 {offsets = [0, 16], sizes = [16, 16], strides = [1, 1]} : vector<16x32xbf16> to vector<16x16xbf16>
    %c0_63 = arith.constant 0 : index
    %c16_64 = arith.constant 16 : index
    %127 = vector.load %arg34[%c0_63, %c16_64] : memref<8x32xbf16, #tpu.memory_space<vmem>>, vector<8x16xbf16>
    %c0_65 = arith.constant 0 : index
    %c16_66 = arith.constant 16 : index
    %128 = vector.load %arg35[%c0_65, %c16_66] : memref<8x32xbf16, #tpu.memory_space<vmem>>, vector<8x16xbf16>
    %cst_67 = arith.constant dense<0.000000e+00> : vector<16x8xf32>
    %129 = tpu.matmul %126, %127, %cst_67 {dimension_numbers = #tpu.dot_dimension_numbers<[1], [1], [0], [0], [0, 0, 1, 0], [], []>} : vector<16x16xbf16>, vector<8x16xbf16>, vector<16x8xf32> -> vector<16x8xf32>
    %cst_68 = arith.constant dense<0xFF800000> : vector<16xf32>
    %130 = vector.multi_reduction <maximumf>, %129, %cst_68 [1] : vector<16x8xf32> to vector<16xf32>
    %131 = vector.shape_cast %130 : vector<16xf32> to vector<16x1xf32>
    %132 = vector.broadcast %131 : vector<16x1xf32> to vector<16x8xf32>
    %133 = arith.subf %129, %132 : vector<16x8xf32>
    %134 = math.exp %133 : vector<16x8xf32>
    %cst_69 = arith.constant dense<0.000000e+00> : vector<16xf32>
    %135 = vector.multi_reduction <add>, %134, %cst_69 [1] : vector<16x8xf32> to vector<16xf32>
    %136 = vector.shape_cast %135 : vector<16xf32> to vector<16x1xf32>
    %137 = arith.truncf %134 : vector<16x8xf32> to vector<16x8xbf16>
    %cst_70 = arith.constant dense<0.000000e+00> : vector<16x16xf32>
    %138 = tpu.matmul %137, %128, %cst_70 {dimension_numbers = #tpu.dot_dimension_numbers<[1], [0], [0], [1], [0, 0, 1, 1], [], []>} : vector<16x8xbf16>, vector<8x16xbf16>, vector<16x16xf32> -> vector<16x16xf32>
    %139 = tpu.reciprocal %136 {approx = true} : vector<16x1xf32> -> vector<16x1xf32>
    %140 = vector.broadcast %139 : vector<16x1xf32> to vector<16x16xf32>
    %141 = arith.mulf %138, %140 : vector<16x16xf32>
    %142 = arith.truncf %141 : vector<16x16xf32> to vector<16x16xbf16>
    %143 = tpu.concatenate %125, %142 in 1 : vector<16x16xbf16>, vector<16x16xbf16> -> vector<16x32xbf16>
    %cst_71 = arith.constant dense<0.000000e+00> : vector<16x32xf32>
    %144 = tpu.matmul %143, %98, %cst_71 {dimension_numbers = #tpu.dot_dimension_numbers<[1], [0], [0], [1], [0, 0, 1, 1], [], []>} : vector<16x32xbf16>, vector<32x32xbf16>, vector<16x32xf32> -> vector<16x32xf32>
    %145 = vector.broadcast %99 : vector<1x32xf32> to vector<16x32xf32>
    %146 = arith.addf %144, %145 : vector<16x32xf32>
    %147 = arith.addf %146, %95 : vector<16x32xf32>
    %cst_72 = arith.constant dense<0.000000e+00> : vector<16xf32>
    %148 = vector.multi_reduction <add>, %147, %cst_72 [1] : vector<16x32xf32> to vector<16xf32>
    %149 = vector.shape_cast %148 : vector<16xf32> to vector<16x1xf32>
    %cst_73 = arith.constant 3.200000e+01 : f32
    %150 = vector.broadcast %cst_73 : f32 to vector<16x1xf32>
    %151 = arith.divf %149, %150 : vector<16x1xf32>
    %152 = vector.broadcast %151 : vector<16x1xf32> to vector<16x32xf32>
    %153 = arith.subf %147, %152 : vector<16x32xf32>
    %154 = arith.mulf %153, %153 : vector<16x32xf32>
    %cst_74 = arith.constant dense<0.000000e+00> : vector<16xf32>
    %155 = vector.multi_reduction <add>, %154, %cst_74 [1] : vector<16x32xf32> to vector<16xf32>
    %156 = vector.shape_cast %155 : vector<16xf32> to vector<16x1xf32>
    %cst_75 = arith.constant 3.200000e+01 : f32
    %157 = vector.broadcast %cst_75 : f32 to vector<16x1xf32>
    %158 = arith.divf %156, %157 : vector<16x1xf32>
    %159 = vector.broadcast %151 : vector<16x1xf32> to vector<16x32xf32>
    %160 = arith.subf %147, %159 : vector<16x32xf32>
    %cst_76 = arith.constant 9.99999974E-6 : f32
    %161 = vector.broadcast %cst_76 : f32 to vector<16x1xf32>
    %162 = arith.addf %158, %161 : vector<16x1xf32>
    %163 = math.rsqrt %162 : vector<16x1xf32>
    %164 = vector.broadcast %163 : vector<16x1xf32> to vector<16x32xf32>
    %165 = arith.mulf %160, %164 : vector<16x32xf32>
    %166 = vector.broadcast %100 : vector<1x32xf32> to vector<16x32xf32>
    %167 = arith.mulf %165, %166 : vector<16x32xf32>
    %168 = vector.broadcast %101 : vector<1x32xf32> to vector<16x32xf32>
    %169 = arith.addf %167, %168 : vector<16x32xf32>
    %170 = vector.broadcast %10 : vector<16x1xf32> to vector<16x32xf32>
    %171 = arith.mulf %169, %170 : vector<16x32xf32>
    %172 = arith.truncf %171 : vector<16x32xf32> to vector<16x32xbf16>
    %c0_77 = arith.constant 0 : index
    %c0_78 = arith.constant 0 : index
    %173 = vector.load %arg25[%c0_77, %c0_78] : memref<32x64xbf16, #tpu.memory_space<vmem>>, vector<32x64xbf16>
    %cst_79 = arith.constant dense<0.000000e+00> : vector<16x64xf32>
    %174 = tpu.matmul %172, %173, %cst_79 {dimension_numbers = #tpu.dot_dimension_numbers<[1], [0], [0], [1], [0, 0, 1, 1], [], []>} : vector<16x32xbf16>, vector<32x64xbf16>, vector<16x64xf32> -> vector<16x64xf32>
    %c0_80 = arith.constant 0 : index
    %c0_81 = arith.constant 0 : index
    %175 = vector.load %arg26[%c0_80, %c0_81] : memref<1x64xf32, #tpu.memory_space<vmem>>, vector<1x64xf32>
    %176 = vector.broadcast %175 : vector<1x64xf32> to vector<16x64xf32>
    %177 = arith.addf %174, %176 : vector<16x64xf32>
    %cst_82 = arith.constant 0.000000e+00 : f32
    %178 = vector.broadcast %cst_82 : f32 to vector<16x64xf32>
    %179 = arith.maximumf %177, %178 : vector<16x64xf32>
    %180 = arith.truncf %179 : vector<16x64xf32> to vector<16x64xbf16>
    %c0_83 = arith.constant 0 : index
    %c0_84 = arith.constant 0 : index
    %181 = vector.load %arg27[%c0_83, %c0_84] : memref<64x32xbf16, #tpu.memory_space<vmem>>, vector<64x32xbf16>
    %cst_85 = arith.constant dense<0.000000e+00> : vector<16x32xf32>
    %182 = tpu.matmul %180, %181, %cst_85 {dimension_numbers = #tpu.dot_dimension_numbers<[1], [0], [0], [1], [0, 0, 1, 1], [], []>} : vector<16x64xbf16>, vector<64x32xbf16>, vector<16x32xf32> -> vector<16x32xf32>
    %c0_86 = arith.constant 0 : index
    %c0_87 = arith.constant 0 : index
    %183 = vector.load %arg28[%c0_86, %c0_87] : memref<1x32xf32, #tpu.memory_space<vmem>>, vector<1x32xf32>
    %184 = vector.broadcast %183 : vector<1x32xf32> to vector<16x32xf32>
    %185 = arith.addf %182, %184 : vector<16x32xf32>
    %186 = arith.addf %185, %171 : vector<16x32xf32>
    %c0_88 = arith.constant 0 : index
    %c0_89 = arith.constant 0 : index
    %187 = vector.load %arg29[%c0_88, %c0_89] : memref<1x32xf32, #tpu.memory_space<vmem>>, vector<1x32xf32>
    %c0_90 = arith.constant 0 : index
    %c0_91 = arith.constant 0 : index
    %188 = vector.load %arg30[%c0_90, %c0_91] : memref<1x32xf32, #tpu.memory_space<vmem>>, vector<1x32xf32>
    %cst_92 = arith.constant dense<0.000000e+00> : vector<16xf32>
    %189 = vector.multi_reduction <add>, %186, %cst_92 [1] : vector<16x32xf32> to vector<16xf32>
    %190 = vector.shape_cast %189 : vector<16xf32> to vector<16x1xf32>
    %cst_93 = arith.constant 3.200000e+01 : f32
    %191 = vector.broadcast %cst_93 : f32 to vector<16x1xf32>
    %192 = arith.divf %190, %191 : vector<16x1xf32>
    %193 = vector.broadcast %192 : vector<16x1xf32> to vector<16x32xf32>
    %194 = arith.subf %186, %193 : vector<16x32xf32>
    %195 = arith.mulf %194, %194 : vector<16x32xf32>
    %cst_94 = arith.constant dense<0.000000e+00> : vector<16xf32>
    %196 = vector.multi_reduction <add>, %195, %cst_94 [1] : vector<16x32xf32> to vector<16xf32>
    %197 = vector.shape_cast %196 : vector<16xf32> to vector<16x1xf32>
    %cst_95 = arith.constant 3.200000e+01 : f32
    %198 = vector.broadcast %cst_95 : f32 to vector<16x1xf32>
    %199 = arith.divf %197, %198 : vector<16x1xf32>
    %200 = vector.broadcast %192 : vector<16x1xf32> to vector<16x32xf32>
    %201 = arith.subf %186, %200 : vector<16x32xf32>
    %cst_96 = arith.constant 9.99999974E-6 : f32
    %202 = vector.broadcast %cst_96 : f32 to vector<16x1xf32>
    %203 = arith.addf %199, %202 : vector<16x1xf32>
    %204 = math.rsqrt %203 : vector<16x1xf32>
    %205 = vector.broadcast %204 : vector<16x1xf32> to vector<16x32xf32>
    %206 = arith.mulf %201, %205 : vector<16x32xf32>
    %207 = vector.broadcast %187 : vector<1x32xf32> to vector<16x32xf32>
    %208 = arith.mulf %206, %207 : vector<16x32xf32>
    %209 = vector.broadcast %188 : vector<1x32xf32> to vector<16x32xf32>
    %210 = arith.addf %208, %209 : vector<16x32xf32>
    %211 = vector.broadcast %10 : vector<16x1xf32> to vector<16x32xf32>
    %212 = arith.mulf %210, %211 : vector<16x32xf32>
    %213 = arith.truncf %212 : vector<16x32xf32> to vector<16x32xbf16>
    %c0_97 = arith.constant 0 : index
    %c0_98 = arith.constant 0 : index
    %c0_99 = arith.constant 0 : index
    %214 = vector.load %arg31[%c0_97, %c0_98, %c0_99] : memref<1x16x32xbf16, #tpu.memory_space<vmem>>, vector<1x16x32xbf16>
    %215 = vector.shape_cast %214 : vector<1x16x32xbf16> to vector<16x32xbf16>
    %216 = vector.shape_cast %213 : vector<16x32xbf16> to vector<1x16x32xbf16>
    tpu.vector_store %arg31[%c0_97, %c0_98, %c0_99], %216 {strides = array<i32>} : memref<1x16x32xbf16, #tpu.memory_space<vmem>>, vector<1x16x32xbf16>,
    return
  }
  func.func @transform_0(%arg0: i32, %arg1: i32) -> (i32, i32, i32) {
    %c0_i32 = arith.constant 0 : i32
    %c0_i32_0 = arith.constant 0 : i32
    %c0_i32_1 = arith.constant 0 : i32
    return %arg0, %c0_i32, %c0_i32_0 : i32, i32, i32
  }
  func.func @transform_1(%arg0: i32, %arg1: i32) -> (i32, i32, i32) {
    %c0_i32 = arith.constant 0 : i32
    %c0_i32_0 = arith.constant 0 : i32
    %c0_i32_1 = arith.constant 0 : i32
    return %arg0, %c0_i32, %c0_i32_0 : i32, i32, i32
  }
  func.func @transform_2(%arg0: i32, %arg1: i32) -> (i32, i32, i32) {
    %c0_i32 = arith.constant 0 : i32
    %c0_i32_0 = arith.constant 0 : i32
    return %arg0, %arg1, %c0_i32 : i32, i32, i32
  }
  func.func @transform_3(%arg0: i32, %arg1: i32) -> (i32, i32) {
    %c0_i32 = arith.constant 0 : i32
    %c0_i32_0 = arith.constant 0 : i32
    %c0_i32_1 = arith.constant 0 : i32
    return %c0_i32, %c0_i32_0 : i32, i32
  }
  func.func @transform_4(%arg0: i32, %arg1: i32) -> (i32, i32) {
    %c0_i32 = arith.constant 0 : i32
    %c0_i32_0 = arith.constant 0 : i32
    %c0_i32_1 = arith.constant 0 : i32
    return %c0_i32, %c0_i32_0 : i32, i32
  }
  func.func @transform_5(%arg0: i32, %arg1: i32) -> (i32, i32) {
    %c0_i32 = arith.constant 0 : i32
    %c0_i32_0 = arith.constant 0 : i32
    %c0_i32_1 = arith.constant 0 : i32
    return %c0_i32, %c0_i32_0 : i32, i32
  }
  func.func @transform_6(%arg0: i32, %arg1: i32) -> (i32, i32) {
    %c0_i32 = arith.constant 0 : i32
    %c0_i32_0 = arith.constant 0 : i32
    %c0_i32_1 = arith.constant 0 : i32
    return %c0_i32, %c0_i32_0 : i32, i32
  }
  func.func @transform_7(%arg0: i32, %arg1: i32) -> (i32, i32) {
    %c0_i32 = arith.constant 0 : i32
    %c0_i32_0 = arith.constant 0 : i32
    %c0_i32_1 = arith.constant 0 : i32
    return %c0_i32, %c0_i32_0 : i32, i32
  }
  func.func @transform_8(%arg0: i32, %arg1: i32) -> (i32, i32) {
    %c0_i32 = arith.constant 0 : i32
    %c0_i32_0 = arith.constant 0 : i32
    %c0_i32_1 = arith.constant 0 : i32
    return %c0_i32, %c0_i32_0 : i32, i32
  }
  func.func @transform_9(%arg0: i32, %arg1: i32) -> (i32, i32) {
    %c0_i32 = arith.constant 0 : i32
    %c0_i32_0 = arith.constant 0 : i32
    %c0_i32_1 = arith.constant 0 : i32
    return %c0_i32, %c0_i32_0 : i32, i32
  }
  func.func @transform_10(%arg0: i32, %arg1: i32) -> (i32, i32) {
    %c0_i32 = arith.constant 0 : i32
    %c0_i32_0 = arith.constant 0 : i32
    %c0_i32_1 = arith.constant 0 : i32
    return %c0_i32, %c0_i32_0 : i32, i32
  }
  func.func @transform_11(%arg0: i32, %arg1: i32) -> (i32, i32) {
    %c0_i32 = arith.constant 0 : i32
    %c0_i32_0 = arith.constant 0 : i32
    %c0_i32_1 = arith.constant 0 : i32
    return %c0_i32, %c0_i32_0 : i32, i32
  }
  func.func @transform_12(%arg0: i32, %arg1: i32) -> (i32, i32) {
    %c0_i32 = arith.constant 0 : i32
    %c0_i32_0 = arith.constant 0 : i32
    %c0_i32_1 = arith.constant 0 : i32
    return %c0_i32, %c0_i32_0 : i32, i32
  }
  func.func @transform_13(%arg0: i32, %arg1: i32) -> (i32, i32) {
    %c0_i32 = arith.constant 0 : i32
    %c0_i32_0 = arith.constant 0 : i32
    %c0_i32_1 = arith.constant 0 : i32
    return %c0_i32, %c0_i32_0 : i32, i32
  }
  func.func @transform_14(%arg0: i32, %arg1: i32) -> (i32, i32) {
    %c0_i32 = arith.constant 0 : i32
    %c0_i32_0 = arith.constant 0 : i32
    %c0_i32_1 = arith.constant 0 : i32
    return %c0_i32, %c0_i32_0 : i32, i32
  }
  func.func @transform_15(%arg0: i32, %arg1: i32) -> (i32, i32) {
    %c0_i32 = arith.constant 0 : i32
    %c0_i32_0 = arith.constant 0 : i32
    %c0_i32_1 = arith.constant 0 : i32
    return %c0_i32, %c0_i32_0 : i32, i32
  }
  func.func @transform_16(%arg0: i32, %arg1: i32) -> (i32, i32) {
    %c0_i32 = arith.constant 0 : i32
    %c0_i32_0 = arith.constant 0 : i32
    %c0_i32_1 = arith.constant 0 : i32
    return %c0_i32, %c0_i32_0 : i32, i32
  }
  func.func @transform_17(%arg0: i32, %arg1: i32) -> (i32, i32) {
    %c0_i32 = arith.constant 0 : i32
    %c0_i32_0 = arith.constant 0 : i32
    %c0_i32_1 = arith.constant 0 : i32
    return %c0_i32, %c0_i32_0 : i32, i32
  }
  func.func @transform_18(%arg0: i32, %arg1: i32) -> (i32, i32) {
    %c0_i32 = arith.constant 0 : i32
    %c0_i32_0 = arith.constant 0 : i32
    %c0_i32_1 = arith.constant 0 : i32
    return %c0_i32, %c0_i32_0 : i32, i32
  }
  func.func @transform_19(%arg0: i32, %arg1: i32) -> (i32, i32) {
    %c0_i32 = arith.constant 0 : i32
    %c0_i32_0 = arith.constant 0 : i32
    %c0_i32_1 = arith.constant 0 : i32
    return %c0_i32, %c0_i32_0 : i32, i32
  }
  func.func @transform_20(%arg0: i32, %arg1: i32) -> (i32, i32) {
    %c0_i32 = arith.constant 0 : i32
    %c0_i32_0 = arith.constant 0 : i32
    %c0_i32_1 = arith.constant 0 : i32
    return %c0_i32, %c0_i32_0 : i32, i32
  }
  func.func @transform_21(%arg0: i32, %arg1: i32) -> (i32, i32) {
    %c0_i32 = arith.constant 0 : i32
    %c0_i32_0 = arith.constant 0 : i32
    %c0_i32_1 = arith.constant 0 : i32
    return %c0_i32, %c0_i32_0 : i32, i32
  }
  func.func @transform_22(%arg0: i32, %arg1: i32) -> (i32, i32) {
    %c0_i32 = arith.constant 0 : i32
    %c0_i32_0 = arith.constant 0 : i32
    %c0_i32_1 = arith.constant 0 : i32
    return %c0_i32, %c0_i32_0 : i32, i32
  }
  func.func @transform_23(%arg0: i32, %arg1: i32) -> (i32, i32) {
    %c0_i32 = arith.constant 0 : i32
    %c0_i32_0 = arith.constant 0 : i32
    %c0_i32_1 = arith.constant 0 : i32
    return %c0_i32, %c0_i32_0 : i32, i32
  }
  func.func @transform_24(%arg0: i32, %arg1: i32) -> (i32, i32) {
    %c0_i32 = arith.constant 0 : i32
    %c0_i32_0 = arith.constant 0 : i32
    %c0_i32_1 = arith.constant 0 : i32
    return %c0_i32, %c0_i32_0 : i32, i32
  }
  func.func @transform_25(%arg0: i32, %arg1: i32) -> (i32, i32) {
    %c0_i32 = arith.constant 0 : i32
    %c0_i32_0 = arith.constant 0 : i32
    %c0_i32_1 = arith.constant 0 : i32
    return %c0_i32, %c0_i32_0 : i32, i32
  }
  func.func @transform_26(%arg0: i32, %arg1: i32) -> (i32, i32) {
    %c0_i32 = arith.constant 0 : i32
    %c0_i32_0 = arith.constant 0 : i32
    %c0_i32_1 = arith.constant 0 : i32
    return %c0_i32, %c0_i32_0 : i32, i32
  }
  func.func @transform_27(%arg0: i32, %arg1: i32) -> (i32, i32) {
    %c0_i32 = arith.constant 0 : i32
    %c0_i32_0 = arith.constant 0 : i32
    %c0_i32_1 = arith.constant 0 : i32
    return %c0_i32, %c0_i32_0 : i32, i32
  }
  func.func @transform_28(%arg0: i32, %arg1: i32) -> (i32, i32) {
    %c0_i32 = arith.constant 0 : i32
    %c0_i32_0 = arith.constant 0 : i32
    %c0_i32_1 = arith.constant 0 : i32
    return %c0_i32, %c0_i32_0 : i32, i32
  }
  func.func @transform_29(%arg0: i32, %arg1: i32) -> (i32, i32, i32) {
    %c0_i32 = arith.constant 0 : i32
    %c0_i32_0 = arith.constant 0 : i32
    return %arg0, %arg1, %c0_i32 : i32, i32, i32
  }
}

</mosaic_0001>

<bundles_post_ra>
// kernel: tpu_custom_call.1
= control target key start
LH: loop header
LB: loop body
LE: loop exit
PB: predicated region body
PF: predicated region fallthrough
CT: control target
= control target key end

     0   :  { %s3970_s6 = smov 1   ;;  %s3971_s10 = smov 2   ;;  %s4715_s0 = inlined_call_operand.smem [shape: u32[30], index: -1, kind: input, shape index: {}] }
   0x1   :  { %s4030_s5 = sld [smem:[%s4715_s0]]   ;;  %s3972_s14 = smov 3  }
   0x2   :  { %s4035_s9 = sld [smem:[%s4715_s0 + %s3970_s6]]   ;;  %s3973_s18 = smov 4  }
   0x3   :  { %s4040_s13 = sld [smem:[%s4715_s0 + %s3971_s10]]   ;;  %s3974_s22 = smov 5  }
   0x4   :  { %s4045_s17 = sld [smem:[%s4715_s0 + %s3972_s14]]   ;;  %s3975_s26 = smov 6  }
   0x5   :  { %s4050_s21 = sld [smem:[%s4715_s0 + %s3973_s18]]   ;;  %s3976_s30 = smov 7  }
   0x6   :  { %s4055_s25 = sld [smem:[%s4715_s0 + %s3974_s22]]   ;;  %s3977_s4 = smov 8  }
   0x7   :  { %4738 = sst [smem:[#allocation32_spill]] %s4030_s5  ;;  %s3978_s10 = smov 9  }
   0x8   :  { %4739 = sst [smem:[#allocation33_spill]] %s4035_s9  ;;  %s3979_s15 = smov 10  }
   0x9   :  { %4740 = sst [smem:[#allocation34_spill]] %s4040_s13  ;;  %s3980_s20 = smov 11  }
   0xa   :  { %4741 = sst [smem:[#allocation35_spill]] %s4045_s17  ;;  %s3982_s1 = smov 13  }
   0xb   :  { %4742 = sst [smem:[#allocation36_spill]] %s4050_s21  ;;  %s3983_s7 = smov 14  }
   0xc   :  { %4743 = sst [smem:[#allocation37_spill]] %s4055_s25  ;;  %s3985_s22 = smov 16  }
   0xd   :  { %s4060_s29 = sld [smem:[%s4715_s0 + %s3975_s26]]   ;;  %s3981_s26 = smov 12  }
   0xe   :  { %s4065_s3 = sld [smem:[%s4715_s0 + %s3976_s30]]   ;;  %s3986_s28 = smov 17  }
   0xf   :  { %s4070_s8 = sld [smem:[%s4715_s0 + %s3977_s4]]  }
  0x10   :  { %s4075_s14 = sld [smem:[%s4715_s0 + %s3978_s10]]  }
  0x11   :  { %s4080_s19 = sld [smem:[%s4715_s0 + %s3979_s15]]   ;;  %s3984_s15 = smov 15  }
  0x12   :  { %s4085_s24 = sld [smem:[%s4715_s0 + %s3980_s20]]  }
  0x13   :  { %4744 = sst [smem:[#allocation38_spill]] %s4060_s29 }
  0x14   :  { %4745 = sst [smem:[#allocation39_spill]] %s4065_s3 }
  0x15   :  { %4746 = sst [smem:[#allocation40_spill]] %s4070_s8 }
  0x16   :  { %4747 = sst [smem:[#allocation41_spill]] %s4075_s14 }
  0x17   :  { %4748 = sst [smem:[#allocation42_spill]] %s4080_s19 }
  0x18   :  { %4749 = sst [smem:[#allocation43_spill]] %s4085_s24 }
  0x19   :  { %s4090_s30 = sld [smem:[%s4715_s0 + %s3981_s26]]  }
  0x1a   :  { %s4095_s6 = sld [smem:[%s4715_s0 + %s3982_s1]]  }
  0x1b   :  { %s4100_s12 = sld [smem:[%s4715_s0 + %s3983_s7]]   ;;  %s3987_s7 = smov 18  }
  0x1c   :  { %s4105_s20 = sld [smem:[%s4715_s0 + %s3984_s15]]   ;;  %s3988_s15 = smov 19  }
  0x1d   :  { %s4110_s27 = sld [smem:[%s4715_s0 + %s3985_s22]]   ;;  %s3989_s22 = smov 20  }
  0x1e   :  { %s4115_s4 = sld [smem:[%s4715_s0 + %s3986_s28]]   ;;  %s3990_s28 = smov 21  }
  0x1f   :  { %4750 = sst [smem:[#allocation44_spill]] %s4090_s30 }
  0x20   :  { %4751 = sst [smem:[#allocation45_spill]] %s4095_s6 }
  0x21   :  { %4752 = sst [smem:[#allocation46_spill]] %s4100_s12 }
  0x22   :  { %4753 = sst [smem:[#allocation47_spill]] %s4105_s20 }
  0x23   :  { %4754 = sst [smem:[#allocation48_spill]] %s4110_s27 }
  0x24   :  { %4755 = sst [smem:[#allocation49_spill]] %s4115_s4 }
  0x25   :  { %s4120_s24 = sld [smem:[%s4715_s0 + %s3987_s7]]   ;;  %s3991_s7 = smov 22  }
  0x26   :  { %s4125_s6 = sld [smem:[%s4715_s0 + %s3988_s15]]   ;;  %s3992_s15 = smov 23  }
  0x27   :  { %s4130_s19 = sld [smem:[%s4715_s0 + %s3989_s22]]   ;;  %s3993_s22 = smov 24  }
  0x28   :  { %s4135_s14 = sld [smem:[%s4715_s0 + %s3990_s28]]   ;;  %s3994_s28 = smov 25  }
  0x29   :  { %s4140_s17 = sld [smem:[%s4715_s0 + %s3991_s7]]   ;;  %s3995_s7 = smov 26  }
  0x2a   :  { %s4145_s20 = sld [smem:[%s4715_s0 + %s3992_s15]]   ;;  %s3996_s15 = smov 27  }
  0x2b   :  { %4756 = sst [smem:[#allocation50_spill]] %s4120_s24 }
  0x2c   :  { %4757 = sst [smem:[#allocation51_spill]] %s4125_s6 }
  0x2d   :  { %4758 = sst [smem:[#allocation52_spill]] %s4130_s19 }
  0x2e   :  { %4759 = sst [smem:[#allocation53_spill]] %s4135_s14 }
  0x2f   :  { %4760 = sst [smem:[#allocation54_spill]] %s4140_s17 }
  0x30   :  { %4761 = sst [smem:[#allocation55_spill]] %s4145_s20 }
  0x31   :  { %s4150_s19 = sld [smem:[%s4715_s0 + %s3993_s22]]   ;;  %s3997_s22 = smov 28  }
  0x32   :  { %s4155_s14 = sld [smem:[%s4715_s0 + %s3994_s28]]   ;;  %s3998_s28 = smov 29  }
  0x33   :  { %s4160_s17 = sld [smem:[%s4715_s0 + %s3995_s7]]  }
  0x34   :  { %s4165_s3 = sld [smem:[%s4715_s0 + %s3996_s15]]  }
  0x37   :  { %4762 = sst [smem:[#allocation56_spill]] %s4150_s19 }
  0x38   :  { %4763 = sst [smem:[#allocation57_spill]] %s4155_s14 }
  0x39   :  { %4764 = sst [smem:[#allocation58_spill]] %s4160_s17 }
  0x3a   :  { %4765 = sst [smem:[#allocation59_spill]] %s4165_s3 }
  0x3b   :  { %s4170_s19 = sld [smem:[%s4715_s0 + %s3997_s22]]  }
  0x3c   :  { %s4175_s14 = sld [smem:[%s4715_s0 + %s3998_s28]]  }
  0x41   :  { %4766 = sst [smem:[#allocation60_spill]] %s4170_s19 }
  0x42   :  { %4767 = sst [smem:[#allocation61_spill]] %s4175_s14 }
  0x43   :  { %64 = vsyncpa [#allocation7], 0 }
  0x44   :  { %66 = vsyncpa [#allocation7 + $0x1], 0 }
  0x45   :  { %67 = vsyncpa [#allocation10], 0 }
  0x46   :  { %68 = vsyncpa [#allocation13], 0 }
  0x47   :  { %69 = vsyncpa [#allocation16], 0 }
  0x48   :  { %70 = vsyncpa [#allocation19], 0 }
  0x49   :  { %71 = vsyncpa [#allocation22], 0 }
  0x4a   :  { %72 = vsyncpa [#allocation8], 0 }
  0x4b   :  { %74 = vsyncpa [#allocation8 + $0x1], 0  ;;  %s4177_s7 = smov 0   ;;  %s4179_s10 = smov 0  }
  0x4c   :  { %s4181_s11 = smov 0   ;;  %s4183_s15 = smov 0  }
  0x4d   :  { %s4185_s16 = smov 0   ;;  %s4187_s0 = smov 0  }
  0x4e   :  { %s4189_s18 = smov 0   ;;  %s4191_s22 = smov 0  }
  0x4f   :  { %s4193_s23 = smov 0   ;;  %s4195_s26 = smov 0  }
  0x50   :  { %s4197_s28 = smov 0  }
  0x51 LB: > { %s4768_s9 = sld [smem:[#allocation33_spill]]  ;;  %s4724_s1 = sadd.s32 4294967295, %s3968_s28   ;;  %s3928_s7 = sphi %s4177_s7, %s4828_s7   ;;  %s3968_s28 = sphi %s4197_s28, %s80_s28   ;;  %s3964_s26 = sphi %s4195_s26, %s4837_s26   ;;  %s3960_s23 = sphi %s4193_s23, %s4836_s23   ;;  %s3956_s22 = sphi %s4191_s22, %s4835_s22   ;;  %s3952_s18 = sphi %s4189_s18, %s4834_s18   ;;  %s3948_s0 = sphi %s4187_s0, %s4833_s0   ;;  %s3944_s16 = sphi %s4185_s16, %s4832_s16   ;;  %s3940_s15 = sphi %s4183_s15, %s4831_s15   ;;  %s3936_s11 = sphi %s4181_s11, %s4830_s11   ;;  %s3932_s10 = sphi %s4179_s10, %s4829_s10  }
  0x52   : > { %4769 = sst [smem:[#allocation62_spill]] %s3952_s18  ;;  %p2896_p0 = scmp.ge.s32.totalorder %s3968_s28, 1 }
  0x53   : > { %4770 = sst [smem:[#allocation63_spill]] %s3956_s22  ;;  %p4236_p1 = scmp.eq.s32.totalorder %s4724_s1, 0 }
  0x54   : > { %p751_p2 = scmp.lt.s32.totalorder %s3968_s28, 5  ;;  %s3999_s19 = smov [#allocation9]  }
  0x55   : > { %s4771_s2 = scalar_select %p4236_p1, 1, 0 }
  0x56   : > { %p4241_p3 = pnand %p2896_p0, %p751_p2  ;;  %s767_s3 = sshll.u32 %s3999_s19, 4  ;;  %s768_s3 = int_to_ptr.vmem [resolvable:$true] %s767_s3 }
  0x57   : > { %s4000_s17 = smov [#allocation12]   ;;  %s4001_s13 = smov [#allocation15]  }
  0x58   : > { %s4772_s14 = scalar_select %p4241_p3, 1, 0 }
  0x59   : > { %p3263_p4 = pneg %p4241_p3  ;;  %s795_s25 = sshll.u32 %s4000_s17, 4  ;;  %s796_s25 = int_to_ptr.vmem [resolvable:$true] %s795_s25 }
  0x5a   : > { %s829_s5 = sshll.u32 %s4001_s13, 4  ;;  %s3551_s19 = scalar_lea.vmem %s768_s3, 16  ;;  %s4253_s5 = int_to_ptr.vmem [resolvable:$true] %s829_s5 }
  0x5b   : > { %p4249_p5 = pnand %p3263_p4, %p4236_p1  ;;  %p3552_p7 = scmp.ne.s32.totalorder %s768_s3, %s3551_s19 }
  0x5c   : > { %s3558_s17 = scalar_lea.vmem %s768_s3, 32  ;;  %p3559_p10 = scmp.lt.s32.totalorder %s768_s3, %s768_s3 }
  0x5d   : > { %p4257_p6 = pneg %p4249_p5  ;;  %p3560_p11 = scmp.lt.s32.totalorder %s3558_s17, %s3551_s19 }
  0x5f   : > { %p3554_p8 = pnand %p3552_p7, %p4257_p6  ;;  %p3561_p12 = por %p3560_p11, %p3559_p10 }
  0x61   : > { %p3555_p9 = pneg %p3554_p8 }
  0x63   : > { %p3562_p13 = pnand %p3561_p12, %p3555_p9 }
  0x65   : > { %3565 = shalt.err (!%p3562_p13)
}
  0x66   : > { %s4775_s21 = sld [smem:[#allocation36_spill]]  ;;  %s3577_s13 = scalar_lea.vmem %s796_s25, 16 }
  0x67   : > { %p3578_p0 = scmp.ne.s32.totalorder %s796_s25, %s3577_s13  ;;  %s3584_s22 = scalar_lea.vmem %s796_s25, 32 }
  0x68   : > { %p3585_p3 = scmp.lt.s32.totalorder %s796_s25, %s796_s25  ;;  %p3586_p7 = scmp.lt.s32.totalorder %s3584_s22, %s3577_s13 }
  0x69   : > { %p3580_p2 = pnand %p3578_p0, %p4257_p6 }
  0x6a   : > { %p3587_p8 = por %p3586_p7, %p3585_p3 }
  0x6b   : > { %p3581_p4 = pneg %p3580_p2 }
  0x6c   : > { %3266 = dma.hbm_to_vmem [thread:$0]  (!%p4249_p5), %s4775_s21, 16, %s768_s3, [#allocation10]  }
  0x6d   : > { %p3588_p1 = pnand %p3587_p8, %p3581_p4 }
  0x6f   : > { %3591 = shalt.err (!%p3588_p1)
}
  0x70   : > { %s4776_s8 = sld [smem:[#allocation40_spill]]  ;;  %s3603_s3 = scalar_lea.vmem %s4253_s5, 16 }
  0x71   : > { %p3604_p9 = scmp.ne.s32.totalorder %s4253_s5, %s3603_s3  ;;  %s3610_s19 = scalar_lea.vmem %s4253_s5, 32 }
  0x72   : > { %p3611_p12 = scmp.lt.s32.totalorder %s4253_s5, %s4253_s5  ;;  %p3612_p3 = scmp.lt.s32.totalorder %s3610_s19, %s3603_s3 }
  0x73   : > { %p3606_p10 = pnand %p3604_p9, %p4257_p6 }
  0x74   : > { %p3613_p13 = por %p3612_p3, %p3611_p12 }
  0x75   : > { %p3607_p11 = pneg %p3606_p10 }
  0x76   : > { %3272 = dma.hbm_to_vmem [thread:$0]  (!%p4249_p5), %s4776_s8, 16, %s796_s25, [#allocation13]  }
  0x77   : > { %p3614_p1 = pnand %p3613_p13, %p3607_p11 }
  0x79   : > { %3617 = shalt.err (!%p3614_p1)
}
  0x7a   : > { %s4777_s12 = sld [smem:[#allocation46_spill]]  ;;  %s4002_s22 = smov [#allocation18]  }
  0x7b   : > { %s853_s25 = sshll.u32 %s4002_s22, 4  ;;  %s854_s25 = int_to_ptr.vmem [resolvable:$true] %s853_s25 }
  0x7c   : > { %s3629_s17 = scalar_lea.vmem %s854_s25, 256  ;;  %p3637_p7 = scmp.lt.s32.totalorder %s854_s25, %s854_s25 }
  0x7d   : > { %p3630_p0 = scmp.ne.s32.totalorder %s854_s25, %s3629_s17  ;;  %p3638_p8 = scmp.lt.s32.totalorder %s3629_s17, %s3629_s17 }
  0x7f   : > { %p3632_p2 = pnand %p3630_p0, %p4257_p6  ;;  %p3639_p9 = por %p3638_p8, %p3637_p7 }
  0x80   : > { %3278 = dma.hbm_to_vmem [thread:$0]  (!%p4249_p5), %s4777_s12, 16, %s4253_s5, [#allocation16]  }
  0x81   : > { %p3633_p4 = pneg %p3632_p2 }
  0x83   : > { %p3640_p10 = pnand %p3639_p9, %p3633_p4 }
  0x85   : > { %3643 = shalt.err (!%p3640_p10)
}
  0x86   : > { %s4731_s13 = smov 64   ;;  %s4778_s4 = sld [smem:[#allocation49_spill]] }
  0x87   : > { %s4004_s3 = smov 4   ;;  %s4005_s5 = smov [#allocation21]  }
  0x88   : > { %s877_s19 = sshll.u32 %s4005_s5, 4  ;;  %s4006_s22 = smov [#allocation11]   ;;  %s878_s19 = int_to_ptr.vmem [resolvable:$true] %s877_s19 }
  0x89   : > { %s781_s8 = sshll.u32 %s4006_s22, 4  ;;  %s3655_s17 = scalar_lea.vmem %s878_s19, 256  ;;  %s782_s8 = int_to_ptr.vmem [resolvable:$true] %s781_s8 }
  0x8a   : > { %p3656_p11 = scmp.ne.s32.totalorder %s878_s19, %s3655_s17  ;;  %p3663_p13 = scmp.lt.s32.totalorder %s878_s19, %s878_s19 }
  0x8b   : > { %p3664_p1 = scmp.lt.s32.totalorder %s3655_s17, %s3655_s17 }
  0x8c   : > { %3284 = dma.hbm_to_vmem [thread:$0]  (!%p4249_p5), %s4778_s4, 256, %s854_s25, [#allocation19], %s4731_s13, %s4731_s13, %s4004_s3  }
  0x8d   : > { %p3658_p12 = pnand %p3656_p11, %p4257_p6  ;;  %p3665_p0 = por %p3664_p1, %p3663_p13 }
  0x8f   : > { %p3659_p3 = pneg %p3658_p12 }
  0x91   : > { %p3666_p2 = pnand %p3665_p0, %p3659_p3 }
  0x93   : > { %3669 = shalt.err (!%p3666_p2)
}
  0x94   : > { %s4779_s6 = sld [smem:[#allocation51_spill]]  ;;  %s3681_s25 = scalar_lea.vmem %s782_s8, 16 }
  0x95   : > { %p3682_p4 = scmp.ne.s32.totalorder %s782_s8, %s3681_s25  ;;  %s3688_s5 = scalar_lea.vmem %s782_s8, 32 }
  0x96   : > { %p3689_p9 = scmp.lt.s32.totalorder %s782_s8, %s782_s8  ;;  %p3690_p10 = scmp.lt.s32.totalorder %s3688_s5, %s3681_s25 }
  0x97   : > { %p3684_p7 = pnand %p3682_p4, %p4257_p6 }
  0x98   : > { %p3691_p11 = por %p3690_p10, %p3689_p9 }
  0x99   : > { %p3685_p8 = pneg %p3684_p7 }
  0x9a   : > { %3290 = dma.hbm_to_vmem [thread:$0]  (!%p4249_p5), %s4779_s6, 256, %s878_s19, [#allocation22], %s4731_s13, %s4731_s13, %s4004_s3  }
  0x9b   : > { %p3692_p12 = pnand %p3691_p11, %p3685_p8 }
  0x9d   : > { %3695 = shalt.err (!%p3692_p12)
}
  0x9e   : > { %s4780_s29 = sld [smem:[#allocation38_spill]]  ;;  %s4007_s22 = smov [#allocation14]  }
  0x9f   : > { %s815_s17 = sshll.u32 %s4007_s22, 4  ;;  %s4008_s4 = smov [#allocation17]   ;;  %s816_s17 = int_to_ptr.vmem [resolvable:$true] %s815_s17 }
  0xa0   : > { %s843_s19 = sshll.u32 %s4008_s4, 4  ;;  %s3707_s13 = scalar_lea.vmem %s816_s17, 16  ;;  %s844_s19 = int_to_ptr.vmem [resolvable:$true] %s843_s19 }
  0xa1   : > { %p3708_p3 = scmp.ne.s32.totalorder %s816_s17, %s3707_s13  ;;  %s3714_s25 = scalar_lea.vmem %s816_s17, 32 }
  0xa2   : > { %p3715_p0 = scmp.lt.s32.totalorder %s816_s17, %s816_s17  ;;  %p3716_p2 = scmp.lt.s32.totalorder %s3714_s25, %s3707_s13 }
  0xa3   : > { %p3710_p13 = pnand %p3708_p3, %p4257_p6 }
  0xa4   : > { %3269 = dma.hbm_to_vmem [thread:$0]  (!%p4249_p5), %s4780_s29, 16, %s782_s8, [#allocation10]  }
  0xa5   : > { %p3711_p1 = pneg %p3710_p13  ;;  %p3717_p4 = por %p3716_p2, %p3715_p0 }
  0xa7   : > { %p3718_p7 = pnand %p3717_p4, %p3711_p1 }
  0xa9   : > { %3721 = shalt.err (!%p3718_p7)
}
  0xaa   : > { %s4781_s30 = sld [smem:[#allocation44_spill]]  ;;  %s3733_s8 = scalar_lea.vmem %s844_s19, 16 }
  0xab   : > { %p3734_p8 = scmp.ne.s32.totalorder %s844_s19, %s3733_s8  ;;  %s3740_s4 = scalar_lea.vmem %s844_s19, 32 }
  0xac   : > { %p3741_p11 = scmp.lt.s32.totalorder %s844_s19, %s844_s19  ;;  %p3742_p12 = scmp.lt.s32.totalorder %s3740_s4, %s3733_s8 }
  0xad   : > { %p3736_p9 = pnand %p3734_p8, %p4257_p6 }
  0xae   : > { %p3743_p3 = por %p3742_p12, %p3741_p11 }
  0xaf   : > { %p3737_p10 = pneg %p3736_p9 }
  0xb0   : > { %3275 = dma.hbm_to_vmem [thread:$0]  (!%p4249_p5), %s4781_s30, 16, %s816_s17, [#allocation13]  }
  0xb1   : > { %p3744_p13 = pnand %p3743_p3, %p3737_p10 }
  0xb3   : > { %3747 = shalt.err (!%p3744_p13)
}
  0xb4   : > { %s4782_s27 = sld [smem:[#allocation48_spill]]  ;;  %s4009_s13 = smov [#allocation20]  }
  0xb5   : > { %s867_s5 = sshll.u32 %s4009_s13, 4  ;;  %s4010_s22 = smov [#allocation23]   ;;  %s868_s5 = int_to_ptr.vmem [resolvable:$true] %s867_s5 }
  0xb6   : > { %s899_s17 = sshll.u32 %s4010_s22, 4  ;;  %s3759_s25 = scalar_lea.vmem %s868_s5, 16  ;;  %s900_s17 = int_to_ptr.vmem [resolvable:$true] %s899_s17 }
  0xb7   : > { %p3760_p1 = scmp.ne.s32.totalorder %s868_s5, %s3759_s25  ;;  %s3766_s8 = scalar_lea.vmem %s868_s5, 32 }
  0xb8   : > { %p3767_p4 = scmp.lt.s32.totalorder %s868_s5, %s868_s5  ;;  %p3768_p7 = scmp.lt.s32.totalorder %s3766_s8, %s3759_s25 }
  0xb9   : > { %p3762_p0 = pnand %p3760_p1, %p4257_p6 }
  0xba   : > { %3281 = dma.hbm_to_vmem [thread:$0]  (!%p4249_p5), %s4782_s27, 16, %s844_s19, [#allocation16]  }
  0xbb   : > { %p3763_p2 = pneg %p3762_p0  ;;  %p3769_p8 = por %p3768_p7, %p3767_p4 }
  0xbd   : > { %p3770_p9 = pnand %p3769_p8, %p3763_p2 }
  0xbf   : > { %3773 = shalt.err (!%p3770_p9)
}
  0xc0   : > { %s4783_s24 = sld [smem:[#allocation50_spill]]  ;;  %s3785_s19 = scalar_lea.vmem %s900_s17, 256 }
  0xc1   : > { %p3786_p10 = scmp.ne.s32.totalorder %s900_s17, %s3785_s19  ;;  %p3793_p3 = scmp.lt.s32.totalorder %s900_s17, %s900_s17 }
  0xc2   : > { %p3794_p13 = scmp.lt.s32.totalorder %s3785_s19, %s3785_s19 }
  0xc3   : > { %p3788_p11 = pnand %p3786_p10, %p4257_p6 }
  0xc4   : > { %p3795_p1 = por %p3794_p13, %p3793_p3 }
  0xc5   : > { %p3789_p12 = pneg %p3788_p11 }
  0xc6   : > { %3287 = dma.hbm_to_vmem [thread:$0]  (!%p4249_p5), %s4783_s24, 16, %s868_s5, [#allocation19]  }
  0xc7   : > { %p3796_p0 = pnand %p3795_p1, %p3789_p12 }
  0xc9   : > { %3799 = shalt.err (!%p3796_p0)
}
  0xca   : > { %s4784_s4 = smov 64   ;;  %s4785_s20 = sld [smem:[#allocation55_spill]] }
  0xcb   : > { %s2895_s18 = sadd.s32 4294967294, %s3968_s28   ;;  %s89_s1 = sadd.s32 1, %s3960_s23 }
  0xcc   : > { %p90_p6 = scmp.ge.s32.totalorder %s89_s1, 2  ;;  %s92_s13 = sadd.s32 1, %s3964_s26 }
  0xcd   : > { %s125_s5 = sadd.s32 1, %s3948_s0  ;;  %p132_p2 = scmp.ne.s32.totalorder %s3948_s0, %s3944_s16 }
  0xce   : > { %s4839_s1 = smov (%p90_p6, %s89_s1), 0  ;;  %s4841_s13 = smov (!%p90_p6, %s92_s13), %s3964_s26 }
  0xcf   : > { %p133_p4 = scmp.eq.s32.totalorder %s3968_s28, 0  ;;  %p138_p7 = scmp.ne.s32.totalorder %s3944_s16, %s3940_s15 }
  0xd0   : > { %3293 = dma.hbm_to_vmem [thread:$0]  (!%p4249_p5), %s4785_s20, 256, %s900_s17, [#allocation22], %s4784_s4, %s4784_s4, %s4004_s3  }
  0xd1   : > { %p94_p5 = scmp.ge.s32.totalorder %s4841_s13, 2  ;;  %s723_s3 = ssub.s32 %s3960_s23, %s4839_s1 }
  0xd2   : > { %p4340_p8 = por %p133_p4, %p132_p2  ;;  %p4787_p9 = scmp.ne.s32.totalorder %s4771_s2, 0 }
  0xd3   : > { %s4843_s13 = smov (%p94_p5, %s4841_s13), 0  ;;  %s727_s25 = sadd.s32 1, %s3936_s11 }
  0xd4   : > { %p4346_p10 = por %p4787_p9, %p138_p7  ;;  %4789 = sst [smem:[#allocation64_spill]] %s4843_s13 }
  0xd5   : > { %p737_p11 = scmp.ne.s32.totalorder %s3936_s11, %s3932_s10  ;;  %s122_s15 = ssub.s32 %s3964_s26, %s4843_s13 }
  0xd6   : > { %s4788_s17 = scalar_select %p4346_p10, 1, 0 }
  0xd7   : > { %s4790_s8 = sadd.s32 4294967295, %s3968_s28   ;;  %p123_p3 = scmp.eq.s32.totalorder %s122_s15, 0 }
  0xd8   : > { %p738_p12 = scmp.eq.s32.totalorder %s4790_s8, 3  ;;  %s724_s19 = sor.u32 %s723_s3, %s122_s15 }
  0xd9   : > { %p725_p13 = scmp.eq.s32.totalorder %s724_s19, 0  ;;  %p743_p0 = scmp.ne.s32.totalorder %s3932_s10, %s3928_s7 }
  0xda   : > { %p4359_p1 = por %p738_p12, %p737_p11  ;;  %p744_p6 = scmp.eq.s32.totalorder %s2895_s18, 3 }
  0xdb   : > { %s4364_s6 = scalar_select %p123_p3, %s3948_s0, %s125_s5  }
  0xdc   : > { %s4791_s4 = scalar_select %p4359_p1, 1, 0 }
  0xdd   : > { %s4367_s12 = scalar_select %p725_p13, %s3936_s11, %s727_s25  }
  0xde   : > { %p3312_p2 = scmp.lt.s32.totalorder %s3968_s28, 4  ;;  %s936_s20 = sand.u32 1, %s3948_s0  }
  0xdf   : > { %p4373_p4 = por %p744_p6, %p743_p0  ;;  %s2908_s3 = sshll.u32 %s936_s20, 2 }
  0xe0   : > { %s2909_s15 = sshll.u32 %s3964_s26, 6  ;;  %s940_s5 = scalar_lea.vmem [#allocation6], %s2908_s3 }
  0xe1   : > { %s4792_s8 = scalar_select %p4373_p4, 1, 0 }
  0xe2   : > { %s4379_s19 = scalar_lea.hbm %s4768_s9, %s2909_s15  ;;  %s947_s25 = sshll.u32 %s940_s5, 4  ;;  %s948_s25 = int_to_ptr.vmem [resolvable:$true] %s947_s25 }
  0xe3   : > { %p4383_p7 = pnand %p3312_p2, %p4340_p8  ;;  %s937_s21 = scalar_lea.sflag [#allocation7], %s936_s20 }
  0xe4   : > { %s3800_s24 = scalar_lea.hbm %s4379_s19, 64  ;;  %s3805_s15 = scalar_lea.hbm %s4768_s9, 128 }
  0xe5   : > { %s4793_s18 = scalar_select %p4383_p7, 1, 0 }
  0xe6   : > { %p3801_p5 = scmp.ne.s32.totalorder %s4379_s19, %s3800_s24  ;;  %p3802_p9 = pneg %p4383_p7 }
  0xe7   : > { %p3806_p3 = scmp.lt.s32.totalorder %s4379_s19, %s4768_s9  ;;  %p3807_p13 = scmp.lt.s32.totalorder %s3805_s15, %s3800_s24 }
  0xe8   : > { %p3803_p11 = pnand %p3802_p9, %p3801_p5 }
  0xe9   : > { %p3808_p0 = por %p3807_p13, %p3806_p3 }
  0xea   : > { %p3804_p12 = pneg %p3803_p11 }
  0xec   : > { %p3809_p6 = pnand %p3808_p0, %p3804_p12 }
  0xee   : > { %3812 = shalt.err (!%p3809_p6)
}
  0xef   : > { %s3813_s22 = scalar_lea.vmem %s948_s25, 64  ;;  %s4011_s3 = smov [#allocation6]  }
  0xf0   : > { %p3814_p8 = scmp.ne.s32.totalorder %s948_s25, %s3813_s22  ;;  %s3818_s5 = sshll.u32 %s4011_s3, 4  ;;  %s3819_s5 = int_to_ptr.vmem [resolvable:$false] %s3818_s5 }
  0xf1   : > { %s3820_s20 = scalar_lea.vmem %s3819_s5, 128  ;;  %p3821_p1 = scmp.lt.s32.totalorder %s948_s25, %s3819_s5 }
  0xf2   : > { %p3816_p2 = pnand %p3814_p8, %p3802_p9  ;;  %p3822_p10 = scmp.lt.s32.totalorder %s3820_s20, %s3813_s22 }
  0xf4   : > { %p3817_p4 = pneg %p3816_p2  ;;  %p3823_p7 = por %p3822_p10, %p3821_p1 }
  0xf6   : > { %p3824_p5 = pnand %p3823_p7, %p3817_p4 }
  0xf8   : > { %3827 = shalt.err (!%p3824_p5)
}
  0xf9   : > { %p4794_p11 = scmp.ne.s32.totalorder %s4793_s18, 0  ;;  %p4795_p12 = scmp.ne.s32.totalorder %s4772_s14, 0 }
  0xfa   : > { %s971_s24 = sand.u32 (!%p4795_p12), 1, %s3944_s16   ;;  %p4796_p9 = scmp.ne.s32.totalorder (!%p4795_p12), %s4788_s17, 0 }
  0xfb   : > { %3297 = dma.hbm_to_vmem [thread:$0]  (!%p4794_p11), %s4379_s19, 64, %s948_s25, %s937_s21  }
  0xfc   : > { %969 = sbr.rel (%p4795_p12) target bundleno = 4516 (0x11a4), region = 136  ;;  %s4400_s15 = sshll.u32 (!%p4795_p12), %s971_s24, 2 }
  0xfd   : > { %s972_s3 = scalar_lea.sflag (!%p4795_p12), [#allocation7], %s971_s24 }
 0x101   : > { %3899 = dma.done.wait (%p4796_p9), %s972_s3, 64  }
 0x102   : > { %3901 = vsyncadd (%p4796_p9), %s972_s3, 4294967232  ;;  %p4797_p10 = scmp.ne.s32.totalorder %s4771_s2, 0 }
 0x104   : > { %3903 = dma.done.wait (%p4797_p10), [#allocation10], 32  }
 0x105   : > { %3905 = vsyncadd (%p4797_p10), [#allocation10], 4294967264 }
 0x106   : > { %3907 = dma.done.wait (%p4797_p10), [#allocation13], 32  }
 0x107   : > { %3909 = vsyncadd (%p4797_p10), [#allocation13], 4294967264 }
 0x108   : > { %3911 = dma.done.wait (%p4797_p10), [#allocation16], 32  }
 0x109   : > { %3913 = vsyncadd (%p4797_p10), [#allocation16], 4294967264 }
 0x10a   : > { %3915 = dma.done.wait (%p4797_p10), [#allocation19], 272  }
 0x10b   : > { %3917 = vsyncadd (%p4797_p10), [#allocation19], 4294967024 }
 0x10c   : > { %3919 = dma.done.wait (%p4797_p10), [#allocation22], 512  }
 0x10d   : > { %3921 = vsyncadd (%p4797_p10), [#allocation22], 4294966784  ;;  %s4798_s21 = sld [smem:[#allocation63_spill]]  ;;  %s4736_s25 = sand.u32 1, %s3932_s10  }
 0x10e   : > { %s4799_s14 = sld [smem:[#allocation62_spill]]  ;;  %s2922_s18 = sshll.u32 %s4736_s25, 3 }
 0x10f   : > { %s4800_s17 = sld [smem:[#allocation32_spill]]  ;;  %s4444_s30 = scalar_lea.vmem [#allocation24], %s2922_s18 }
 0x110   : > { %s4801_s19 = sld [smem:[#allocation34_spill]] }
 0x113   : > { %p1104_p1 = scmp.lt.s32.totalorder %s4798_s21, 1 }
 0x114   : > { %s4432_s22 = sshll.u32 %s4799_s14, 1  ;;  %s2928_s27 = sshll.u32 %s4799_s14, 4 }
 0x115   : > { %p1112_p4 = scmp.lt.s32.totalorder %s4432_s22, 3  ;;  %s4845_s21 = smov (!%p1104_p1, %s4798_s21), 1 }
 0x116   : > { %s3014_s5 = sshll.u32 %s4845_s21, 4  ;;  %s2926_s20 = sshll.u32 %s4845_s21, 2 }
 0x117   : > { %s1113_s2 = scalar_select %p1112_p4, %s4432_s22, 3 }
 0x118   : > { %s4438_s24 = scalar_lea.vmem %s4800_s17, %s3014_s5  ;;  %p2929_p7 = scmp.ne.s32.totalorder %s4799_s14, 0 }
 0x119   : > { %s1115_s3 = sadd.s32 %s2926_s20, %s1113_s2  ;;  %s4802_s25 = sld [smem:[#allocation37_spill]] (!%p2929_p7) }
 0x11a   : > { %s2927_s9 = sshll.u32 %s1115_s3, 3  ;;  %1125 = sbr.rel (%p2929_p7) target bundleno = 505 (0x1f9), region = 184 }
 0x11b   : > { %s4442_s29 = scalar_lea.vmem %s4801_s19, %s2927_s9  ;;  %s4803_s13 = sld [smem:[#allocation39_spill]] (!%p2929_p7) }
 0x11c   : > { %s4804_s21 = sld [smem:[#allocation47_spill]] (!%p2929_p7)  ;;  %s4805_s9 = scalar_lea.vmem (!%p2929_p7), [#allocation6], %s4400_s15 }
 0x11f   : > { %v3462_v0 = vld [vmem:[%s4802_s25 + $0x8] sm:$0xff]   ;;  %v3464_v2 = vld [vmem:[%s4802_s25] sm:$0xff]   ;;  %vm1164_vm0 = vcmask 261120   ;;  %v4012_v7 = vmov 0.0   ;;  %vm4013_vm1 = vmmov 0   ;;  %vm1236_vm2 = vcmask 257024  }
 0x120   : > { %3079 = vmatprep.subr.bf16.mxu0 %v3462_v0  ;;  %v3466_v4 = vld [vmem:[%s4438_s24] sm:$0xff]   ;;  %v3467_v5 = vld [vmem:[%s4438_s24 + $0x8] sm:$0xff]   ;;  %v2930_v12 = vld [vmem:[#allocation11] ss:$0 sm:$0xff] }
 0x121   : > { %v3463_v1 = vld [vmem:[%s4803_s13 + $0x8] sm:$0xff]   ;;  %3080 = vmatpush3.bf16.msra.mxu0 %v3462_v0  ;;  %v3465_v3 = vld [vmem:[%s4803_s13] sm:$0xff]   ;;  %3083 = vmatprep.mubr.msk.bf16.mxu0 %vm1164_vm0, %v3466_v4  ;;  %v2941_v13 = vld [vmem:[#allocation12] ss:$0 sm:$0xff] }
 0x122   : > { %3087 = vmatprep.subr.bf16.mxu1 %v3463_v1  ;;  %3081 = vmatprep.subr.bf16.mxu0 %v3464_v2  ;;  %v3468_v6 = vld [vmem:[%s4804_s21 + $0x8] sm:$0xff]   ;;  %v3470_v9 = vld [vmem:[%s4804_s21] sm:$0xff]   ;;  %v2950_v31 = vld [vmem:[#allocation17] ss:$0 sm:$0xff] }
 0x123   : > { %3088 = vmatpush3.bf16.msra.mxu1 %v3463_v1  ;;  %3091 = vmatprep.mubr.msk.bf16.mxu1 %vm1164_vm0, %v3466_v4  ;;  %v3469_v8 = vld [vmem:[#allocation18 + $0x8] sm:$0xff]   ;;  %v3471_v10 = vld [vmem:[#allocation18] sm:$0xff]   ;;  %v2954_v35 = vld [vmem:[#allocation20] ss:$0 sm:$0xff] }
 0x124   : > { %3089 = vmatprep.subr.bf16.mxu1 %v3465_v3  ;;  %v1130_v11 = vld [vmem:[%s4805_s9] sm:$0xf] }
 0x125   : > { %3082 = vmatpush3.bf16.msra.mxu0 %v3464_v2 }
 0x126   : > { %3095 = vmatprep.subr.bf16.mxu0 %v4012_v7 }
 0x127   : > { %3090 = vmatpush3.bf16.msra.mxu1 %v3465_v3 }
 0x128   : > { %3103 = vmatprep.subr.bf16.mxu1 %v4012_v7  ;;  %3084 = vmatmul.mubr.msk.bf16.vlgmr.msra.gmra.mxu0 %vm1164_vm0, %v3467_v5 }
 0x129   : > { %3096 = vmatpush3.bf16.msra.mxu0 %v3468_v6  ;;  %3099 = vmatprep.mubr.msk.bf16.mxu0 %vm4013_vm1, %v4012_v7 }
 0x12a   : > { %3092 = vmatmul.mubr.msk.bf16.vlgmr.msra.gmra.mxu1 %vm1164_vm0, %v3467_v5  ;;  %3097 = vmatprep.subr.bf16.mxu0 %v4012_v7 }
 0x12b   : > { %3104 = vmatpush3.bf16.msra.mxu1 %v3469_v8  ;;  %3107 = vmatprep.mubr.msk.bf16.mxu1 %vm4013_vm1, %v4012_v7 }
 0x12c   : > { %3105 = vmatprep.subr.bf16.mxu1 %v4012_v7 }
 0x12d   : > { %3098 = vmatpush3.bf16.msra.mxu0 %v3470_v9 }
 0x12f   : > { %3106 = vmatpush3.bf16.msra.mxu1 %v3471_v10 }
 0x130   : > { %3100 = vmatmul.mubr.msk.bf16.vlgmr.msra.gmra.mxu0 %vm1164_vm0, %v1130_v11 }
 0x132   : > { %3108 = vmatmul.mubr.msk.bf16.vlgmr.msra.gmra.mxu1 %vm1164_vm0, %v1130_v11 }
 0x1e8   : > { %v3085_v14 = vpop.f32.mrf.mxu0 }
 0x1e9   : > { %v1214_v15 = vadd.f32 %v3085_v14, %v2930_v12 }
 0x1ea   : > { %v3093_v16 = vpop.f32.mrf.mxu1  ;;  %v1205_v18 = vpop.f32.mrf.mxu0 }
 0x1eb   : > { %v1307_v17 = vadd.f32 %v3093_v16, %v2941_v13  ;;  %v3017_v19 = vpack.c.bf16 %v1214_v15, %v1214_v15  ;;  %v1206_v20 = vadd.f32 %v2930_v12, %v1205_v18 }
 0x1ec   : > { %v1298_v21 = vpop.f32.mrf.mxu1  ;;  %v3086_v24 = vpop.f32.mrf.mxu0 }
 0x1ed   : > { %v3021_v22 = vpack.c.bf16 %v1307_v17, %v1307_v17  ;;  %v1299_v23 = vadd.f32 %v2941_v13, %v1298_v21  ;;  %1239 = vst.msk [vmem:[#allocation2 + $0x8] sm:$0xf] %vm1236_vm2, %v3017_v19  ;;  %v3015_v25 = vpack.c.bf16 %v1206_v20, %v1206_v20  ;;  %v1217_v26 = vadd.f32 %v3086_v24, %v2930_v12 }
 0x1ee   : > { %v3094_v27 = vpop.f32.mrf.mxu1  ;;  %v1208_v30 = vpop.f32.mrf.mxu0 }
 0x1ef   : > { %1331 = vst.msk [vmem:[#allocation3 + $0x8] sm:$0xf] %vm1236_vm2, %v3021_v22  ;;  %v3019_v28 = vpack.c.bf16 %v1299_v23, %v1299_v23  ;;  %v1310_v29 = vadd.f32 %v3094_v27, %v2941_v13  ;;  %1237 = vst.msk [vmem:[#allocation2] sm:$0xf] %vm1236_vm2, %v3015_v25  ;;  %v3018_v32 = vpack.c.bf16 %v1217_v26, %v1217_v26 }
 0x1f0   : > { %v1209_v33 = vadd.f32 %v2930_v12, %v1208_v30  ;;  %v1301_v34 = vpop.f32.mrf.mxu1  ;;  %v1393_v38 = vpop.f32.mrf.mxu0 }
 0x1f1   : > { %1329 = vst.msk [vmem:[#allocation3] sm:$0xf] %vm1236_vm2, %v3019_v28  ;;  %v3022_v36 = vpack.c.bf16 %v1310_v29, %v1310_v29  ;;  %v1302_v37 = vadd.f32 %v2941_v13, %v1301_v34  ;;  %1240 = vst.msk [vmem:[#allocation2 + $0xc] sm:$0xf] %vm1236_vm2, %v3018_v32  ;;  %v1394_v40 = vadd.f32 %v2950_v31, %v1393_v38 }
 0x1f2   : > { %v3016_v39 = vpack.c.bf16 %v1209_v33, %v1209_v33  ;;  %v1458_v41 = vpop.f32.mrf.mxu1  ;;  %v3101_v44 = vpop.f32.mrf.mxu0 }
 0x1f3   : > { %1332 = vst.msk [vmem:[#allocation3 + $0xc] sm:$0xf] %vm1236_vm2, %v3022_v36  ;;  %v3020_v42 = vpack.c.bf16 %v1302_v37, %v1302_v37  ;;  %v1459_v43 = vadd.f32 %v2954_v35, %v1458_v41  ;;  %v1399_v45 = vpack.c.bf16 %v1394_v40, %v1394_v40 }
 0x1f4   : > { %1238 = vst.msk [vmem:[#allocation2 + $0x4] sm:$0xf] %vm1236_vm2, %v3016_v39  ;;  %v3109_v46 = vpop.f32.mrf.mxu1  ;;  %v1396_v48 = vpop.f32.mrf.mxu0 }
 0x1f5   : > { %1330 = vst.msk [vmem:[#allocation3 + $0x4] sm:$0xf] %vm1236_vm2, %v3020_v42  ;;  %v1464_v47 = vpack.c.bf16 %v1459_v43, %v1459_v43  ;;  %1400 = vst.msk [vmem:[#allocation4] sm:$0xf] %vm1236_vm2, %v1399_v45 }
 0x1f6   : > { %v1461_v49 = vpop.f32.mrf.mxu1  ;;  %v3102_v50 = vpop.f32.mrf.mxu0 }
 0x1f7   : > { %1465 = vst.msk [vmem:[#allocation5] sm:$0xf] %vm1236_vm2, %v1464_v47 }
 0x1f8   : > { %v3110_v51 = vpop.f32.mrf.mxu1 }
 0x1f9 PF: > { %s4806_s15 = sld [smem:[#allocation35_spill]]  ;;  %v4014_v53 = vmov 0.0   ;;  %vm4015_vm3 = vmmov 0   ;;  %s1466_s19 = sshra.s32 %s2928_s27, 3  ;;  %vm1521_vm4 = vcmask 261120   ;;  %v3477_v55 = vld [vmem:[#allocation2 + $0x8] sm:$0xff]   ;;  %v1476_v6 = vlaneseq }
 0x1fa   : > { %3111 = vmatprep.subr.bf16.mxu0 %v4014_v53  ;;  %3119 = vmatprep.subr.bf16.mxu1 %v4014_v53  ;;  %s2958_s18 = sshll.u32 %s1466_s19, 2  ;;  %vm1587_vm5 = vcmask 130048   ;;  %v2959_v60 = vld [vmem:[#allocation9] ss:$0 sm:$0xff]  ;;  %s4016_s5 = smov 112   ;;  %v1479_v8 = vstv %s2928_s27  ;;  %v3479_v21 = vld [vmem:[#allocation3 + $0x8] sm:$0xff]  }
 0x1fb   : > { %3115 = vmatprep.mubr.msk.bf16.mxu0 %vm4015_vm3, %v4014_v53  ;;  %3123 = vmatprep.mubr.msk.bf16.mxu1 %vm4015_vm3, %v4014_v53  ;;  %s1469_s2 = scalar_lea.vmem %s4438_s24, %s2958_s18  ;;  %v1595_v57 = vsel %vm1587_vm5, %v3477_v55, 0  ;;  %v3478_v58 = vld [vmem:[#allocation2] sm:$0xff]   ;;  %v1477_v7 = vshrl.u32 %v1476_v6, 7  ;;  %v1483_v10 = vand.u32 127, %v1476_v6  ;;  %s4809_s27 = sld [smem:[#allocation41_spill]]  ;;  %vm2104_vm8 = vcmask 64512  }
 0x1fc   : > { %v4485_v56 = vld [vmem:[%s1469_s2] sm:$0xff]   ;;  %3120 = vmatpush3.bf16.xpose.msra.mxu1 %v1595_v57  ;;  %v1592_v59 = vsel %vm1587_vm5, %v3478_v58, 0  ;;  %1725 = vrot.lane.b32.xlu1 %v3477_v55, %s4016_s5  ;;  %v3480_v22 = vld [vmem:[#allocation3] sm:$0xff]   ;;  %s4810_s20 = sld [smem:[#allocation42_spill]]  ;;  %s4017_s24 = smov 16   ;;  %vm2127_vm9 = vcmask 1043456  }
 0x1fd   : > { %3121 = vmatprep.subr.bf16.mxu1 %v4014_v53  ;;  %v1480_v9 = vadd.s32 %v1479_v8, %v1477_v7  ;;  %v1478_v11 = vadd.s32 8, %v1477_v7  ;;  %s4811_s3 = sld [smem:[#allocation45_spill]]  ;;  %vm2531_vm10 = vcmask 523264   ;;  %vm2632_vm11 = vcmask 257024   ;;  %p4825_p13 = scmp.ne.s32.totalorder %s4791_s4, 0 }
 0x1fe   : > { %s4812_s9 = sld [smem:[#allocation43_spill]] }
 0x1ff   : > { %s4807_s14 = smov %s4806_s15  ;;  %v3474_v52 = vld [vmem:[%s4806_s15 + $0x8] sm:$0xff]   ;;  %vm1484_vm6 = vcmp.gt.s32.totalorder %v1483_v10, %v1480_v9  ;;  %v1481_v12 = vadd.s32 %v1479_v8, %v1478_v11  ;;  %s4814_s15 = sld [smem:[#allocation57_spill]] }
 0x200   : > { %3112 = vmatpush3.bf16.msra.mxu0 %v3474_v52  ;;  %v3475_v54 = vld [vmem:[%s4807_s14] sm:$0xff]   ;;  %1723 = vrot.lane.b32.xlu1 %v3478_v58, %s4016_s5  ;;  %s4816_s19 = sld [smem:[#allocation53_spill]] }
 0x201   : > { %3113 = vmatprep.subr.bf16.mxu0 %v4014_v53  ;;  %vm1485_vm7 = vcmp.gt.s32.totalorder %v1483_v10, %v1481_v12  ;;  %s4817_s18 = sld [smem:[#allocation54_spill]] }
 0x202   : > { %s4818_s2 = sld [smem:[#allocation56_spill]] }
 0x204   : > { %3114 = vmatpush3.bf16.msra.mxu0 %v3475_v54  ;;  %3122 = vmatpush3.bf16.xpose.msra.mxu1 %v1592_v59 }
 0x205   : > { %3127 = vmatprep.subr.bf16.mxu0 %v4014_v53  ;;  %3143 = vmatprep.subr.bf16.mxu1 %v4014_v53  ;;  %s4815_s17 = smov %s4814_s15 }
 0x207   : > { %3116 = vmatmul.mubr.msk.bf16.vlgmr.msra.gmra.mxu0 %vm1521_vm4, %v4485_v56 }
 0x208   : > { %3131 = vmatprep.mubr.msk.bf16.mxu0 %vm4015_vm3, %v4014_v53  ;;  %3128 = vmatpush3.bf16.msra.mxu0 %v3479_v21 }
 0x209   : > { %3129 = vmatprep.subr.bf16.mxu0 %v4014_v53 }
 0x20c   : > { %3130 = vmatpush3.bf16.msra.mxu0 %v3480_v22 }
 0x20d   : > { %3135 = vmatprep.subr.bf16.mxu0 %v4014_v53 }
 0x26e   : > { %v1726_v29 = vpop.permute.xlu1 %1725 }
 0x26f   : > { %v1734_v32 = vsel %vm1587_vm5, %v1726_v29, 0 }
 0x272   : > { %v1724_v34 = vpop.permute.xlu1 %1723 }
 0x273   : > { %v1731_v35 = vsel %vm1587_vm5, %v1724_v34, 0 }
 0x2c7   : > { %v1559_v61 = vpop.f32.mrf.mxu0 }
 0x2c8   : > { %v1560_v63 = vadd.f32 %v2959_v60, %v1559_v61 }
 0x2c9   : > { %v3117_v62 = vpop.f32.mrf.mxu0 }
 0x2ca   : > { %v1566_v3 = vmul.f32 0.25, %v1560_v63 }
 0x2cb   : > { %v1562_v0 = vpop.f32.mrf.mxu0 }
 0x2cc   : > { %v1563_v1 = vadd.f32 %v2959_v60, %v1562_v0 }
 0x2cd   : > { %v3118_v2 = vpop.f32.mrf.mxu0 }
 0x2ce   : > { %v1567_v4 = vmul.f32 0.25, %v1563_v1  ;;  %v3481_v2 = vld [vmem:[%s4809_s27 + $0x8] sm:$0xff]  }
 0x2d0   : > { %v1568_v5 = vpack.c.bf16 %v1567_v4, %v1566_v3  ;;  %v3482_v3 = vld [vmem:[%s4809_s27] sm:$0xff]  }
 0x2d2   : > { %3124 = vmatmul.mubr.msk.bf16.vlgmr.msra.gmra.mxu1 %vm1587_vm5, %v1568_v5 }
 0x2d3   : > { %3147 = vmatprep.mubr.msk.bf16.mxu1 %vm4015_vm3, %v4014_v53 }
 0x392   : > { %v1631_v13 = vpop.f32.mrf.mxu1 }
 0x393   : > { %v1638_v14 = vsel %vm1484_vm6, -1e+10, %v1631_v13 }
 0x394   : > { %v3125_v15 = vpop.f32.mrf.mxu1  ;;  %v1640_v16 = vsel %vm1521_vm4, %v1638_v14, -inf }
 0x395   : > { %1641 = vmax.xlane.f32.xlu0 %v1640_v16 }
 0x396   : > { %v1634_v17 = vpop.f32.mrf.mxu1 }
 0x397   : > { %v1639_v18 = vsel %vm1485_vm7, -1e+10, %v1634_v17 }
 0x398   : > { %v3126_v19 = vpop.f32.mrf.mxu1  ;;  %v1643_v20 = vsel %vm1521_vm4, %v1639_v18, -inf }
 0x399   : > { %1644 = vmax.xlane.f32.xlu0 %v1643_v20 }
 0x3af   : > { %1721 = vrot.lane.b32.xlu0 %v1568_v5, %s4016_s5 }
 0x41e   : > { %v1642_v23 = vpop.xlane.xlu0 %1641 }
 0x41f   : > { %v1646_v24 = vsub.f32 %v1638_v14, %v1642_v23 }
 0x421   : > { %v1648_v25 = vmul.f32 1.442695, %v1646_v24  ;;  %v2972_v24 = vld [vmem:[%s4810_s20] ss:$0 sm:$0xff]  ;;  %s4820_s20 = sld [smem:[#allocation59_spill]] }
 0x422   : > { %v1645_v26 = vpop.xlane.xlu0 %1644 }
 0x423   : > { %v1647_v27 = vsub.f32 %v1639_v18, %v1645_v26  ;;  %3496 = vpow2.f32 %v1648_v25  ;;  %v1472_v25 = vunpack.c.l.bf16 %v4485_v56 }
 0x425   : > { %v1650_v28 = vmul.f32 1.442695, %v1647_v27 }
 0x426   : > { %v1722_v36 = vpop.permute.xlu0 %1721 }
 0x427   : > { %3498 = vpow2.f32 %v1650_v28 }
 0x430   : > { %v3497_v30 = vpop.eup %3496 }
 0x431   : > { %v1652_v62 = vsel %vm1521_vm4, %v3497_v30, 0.0 }
 0x434   : > { %v3499_v31 = vpop.eup %3498 }
 0x435   : > { %v1658_v33 = vpack.c.bf16 %v3499_v31, %v3497_v30  ;;  %v1655_v1 = vsel %vm1521_vm4, %v3499_v31, 0.0  ;;  %v1473_v30 = vunpack.c.h.bf16 %v4485_v56 }
 0x437   : > { %3132 = vmatmul.mubr.msk.bf16.vlgmr.msra.gmra.mxu0 %vm1521_vm4, %v1658_v33 }
 0x438   : > { %3136 = vmatpush3.bf16.xpose.msra.mxu0 %v1734_v32  ;;  %3139 = vmatprep.mubr.msk.bf16.mxu0 %vm4015_vm3, %v4014_v53 }
 0x439   : > { %3137 = vmatprep.subr.bf16.mxu0 %v4014_v53 }
 0x440   : > { %3138 = vmatpush3.bf16.xpose.msra.mxu0 %v1731_v35 }
 0x441   : > { %3159 = vmatprep.subr.bf16.mxu0 %v4014_v53 }
 0x447   : > { %3140 = vmatmul.mubr.msk.bf16.vlgmr.msra.gmra.mxu0 %vm1587_vm5, %v1722_v36 }
 0x448   : > { %3163 = vmatprep.mubr.msk.bf16.mxu0 %vm4015_vm3, %v4014_v53 }
 0x4f7   : > { %v4520_v37 = vpop.f32.mrf.mxu0 }
 0x4f9   : > { %v3133_v38 = vpop.f32.mrf.mxu0 }
 0x4fb   : > { %v4522_v39 = vpop.f32.mrf.mxu0 }
 0x4fd   : > { %v3134_v40 = vpop.f32.mrf.mxu0 }
 0x507   : > { %v1770_v41 = vpop.f32.mrf.mxu0 }
 0x508   : > { %v1777_v42 = vsel %vm1484_vm6, -1e+10, %v1770_v41 }
 0x509   : > { %v3141_v43 = vpop.f32.mrf.mxu0  ;;  %v1779_v44 = vsel %vm1521_vm4, %v1777_v42, -inf }
 0x50a   : > { %1780 = vmax.xlane.f32.xlu1 %v1779_v44 }
 0x50b   : > { %v1773_v45 = vpop.f32.mrf.mxu0 }
 0x50c   : > { %v1778_v46 = vsel %vm1485_vm7, -1e+10, %v1773_v45 }
 0x50d   : > { %v3142_v47 = vpop.f32.mrf.mxu0  ;;  %v1782_v48 = vsel %vm1521_vm4, %v1778_v46, -inf }
 0x50e   : > { %1783 = vmax.xlane.f32.xlu0 %v1782_v48  ;;  %v1475_v47 = vld [vmem:[%s4442_s29 + $0x8] sm:$0xff]  ;;  %v1474_v48 = vld [vmem:[%s4442_s29] sm:$0xff]  ;;  %s4813_s29 = sld [smem:[#allocation52_spill]] }
 0x51b   : > { %1800 = vrot.lane.b32.xlu1 %v3479_v21, %s4016_s5 }
 0x524   : > { %1798 = vrot.lane.b32.xlu0 %v3480_v22, %s4016_s5 }
 0x593   : > { %v1781_v49 = vpop.xlane.xlu1 %1780 }
 0x594   : > { %v1785_v50 = vsub.f32 %v1777_v42, %v1781_v49  ;;  %v3483_v49 = vld [vmem:[%s4811_s3 + $0x8] sm:$0xff]  }
 0x595   : > { %3160 = vmatpush3.bf16.msra.mxu0 %v3483_v49 }
 0x596   : > { %v1787_v51 = vmul.f32 1.442695, %v1785_v50  ;;  %3161 = vmatprep.subr.bf16.mxu0 %v4014_v53  ;;  %v3484_v50 = vld [vmem:[%s4811_s3] sm:$0xff]  }
 0x597   : > { %v1784_v52 = vpop.xlane.xlu0 %1783  ;;  %v1801_v54 = vpop.permute.xlu1 %1800 }
 0x598   : > { %3500 = vpow2.f32 %v1787_v51  ;;  %v1786_v55 = vsub.f32 %v1778_v46, %v1784_v52  ;;  %3144 = vmatpush3.bf16.msra.mxu1 %v1801_v54 }
 0x599   : > { %3145 = vmatprep.subr.bf16.mxu1 %v4014_v53  ;;  %3162 = vmatpush3.bf16.msra.mxu0 %v3484_v50 }
 0x59a   : > { %v1789_v57 = vmul.f32 1.442695, %v1786_v55  ;;  %3173 = vmatprep.subr.bf16.mxu0 %v4014_v53 }
 0x59b   : > { %v1799_v58 = vpop.permute.xlu0 %1798 }
 0x59c   : > { %3502 = vpow2.f32 %v1789_v57  ;;  %3146 = vmatpush3.bf16.msra.mxu1 %v1799_v58 }
 0x59d   : > { %3151 = vmatprep.subr.bf16.mxu1 %v4014_v53 }
 0x5a5   : > { %v3501_v59 = vpop.eup %3500 }
 0x5a6   : > { %v1791_v60 = vsel %vm1521_vm4, %v3501_v59, 0.0 }
 0x5a7   : > { %1792 = vadd.xlane.f32.xlu1 %v1791_v60  ;;  %v2976_v60 = vld [vmem:[%s4812_s9] ss:$0 sm:$0xff]  ;;  %s4822_s9 = sld [smem:[#allocation63_spill]] }
 0x5a9   : > { %v3503_v61 = vpop.eup %3502 }
 0x5aa   : > { %v1794_v63 = vsel %vm1521_vm4, %v3503_v61, 0.0  ;;  %v1797_v0 = vpack.c.bf16 %v3503_v61, %v3501_v59 }
 0x5ab   : > { %1653 = vadd.xlane.f32.xlu1 %v1652_v62  ;;  %1795 = vadd.xlane.f32.xlu0 %v1794_v63 }
 0x5ac   : > { %3148 = vmatmul.mubr.msk.bf16.vlgmr.msra.gmra.mxu1 %vm1521_vm4, %v1797_v0  ;;  %v2977_v0 = vld [vmem:[#allocation14] ss:$0 sm:$0xff] }
 0x5ad   : > { %3155 = vmatprep.mubr.msk.bf16.mxu1 %vm4015_vm3, %v4014_v53  ;;  %3152 = vmatpush3.bf16.msra.mxu1 %v3481_v2 }
 0x5ae   : > { %3153 = vmatprep.subr.bf16.mxu1 %v4014_v53 }
 0x5af   : > { %1656 = vadd.xlane.f32.xlu1 %v1655_v1 }
 0x5b1   : > { %3154 = vmatpush3.bf16.msra.mxu1 %v3482_v3 }
 0x5b2   : > { %3167 = vmatprep.subr.bf16.mxu1 %v4014_v53 }
 0x630   : > { %v1793_v4 = vpop.xlane.xlu1 %1792 }
 0x631   : > { %3504 = vrcp.f32 %v1793_v4 }
 0x634   : > { %v1796_v5 = vpop.xlane.xlu0 %1795  ;;  %v1654_v15 = vpop.xlane.xlu1 %1653 }
 0x635   : > { %3506 = vrcp.f32 %v1796_v5 }
 0x638   : > { %v1657_v16 = vpop.xlane.xlu1 %1656 }
 0x639   : > { %3508 = vrcp.f32 %v1657_v16 }
 0x63a   : > { %3510 = vrcp.f32 %v1654_v15 }
 0x63e   : > { %v3505_v8 = vpop.eup %3504 }
 0x642   : > { %v3507_v9 = vpop.eup %3506 }
 0x646   : > { %v3509_v17 = vpop.eup %3508 }
 0x647   : > { %v3511_v18 = vpop.eup %3510  ;;  %v1718_v19 = vmul.f32 %v3509_v17, %v4522_v39 }
 0x648   : > { %v1717_v20 = vmul.f32 %v3511_v18, %v4520_v37  ;;  %v4018_v37 = vmov 0  }
 0x649   : > { %3472 = vset.pattern.permute.xlu0 %v4018_v37  ;;  %3473 = vset.pattern.permute.xlu1 %v4018_v37 }
 0x64a   : > { %v1719_v21 = vpack.c.bf16 %v1718_v19, %v1717_v20 }
 0x66c   : > { %v1841_v6 = vpop.f32.mrf.mxu1 }
 0x66d   : > { %v1850_v11 = vmul.f32 %v3505_v8, %v1841_v6 }
 0x66e   : > { %v3149_v7 = vpop.f32.mrf.mxu1 }
 0x670   : > { %v1844_v10 = vpop.f32.mrf.mxu1 }
 0x671   : > { %v1851_v12 = vmul.f32 %v3507_v9, %v1844_v10  ;;  %v2055_v10 = vld [vmem:[#allocation4] sm:$0xf] }
 0x672   : > { %v3150_v13 = vpop.f32.mrf.mxu1 }
 0x673   : > { %v1852_v14 = vpack.c.bf16 %v1851_v12, %v1850_v11  ;;  %v2984_v11 = vcombine.low %v2055_v10, %v2055_v10  ;;  %v2061_v12 = vsel %vm1587_vm5, %v2055_v10, 0  ;;  %v2978_v13 = vld [vmem:[#allocation15] ss:$0 sm:$0xff] }
 0x675   : > { %1854 = vrot.lane.b32.xlu1 %v1852_v14, %s4017_s24 }
 0x6e7   : > { %v1855_v22 = vpop.permute.xlu1 %1854 }
 0x6e8   : > { %v1858_v23 = vsel %vm1587_vm5, %v1719_v21, %v1855_v22 }
 0x6e9   : > { %3156 = vmatmul.mubr.msk.bf16.vlgmr.msra.gmra.mxu1 %vm1521_vm4, %v1858_v23 }
 0x6ea   : > { %3169 = vmatprep.mubr.msk.bf16.mxu1 %vm4015_vm3, %v4014_v53  ;;  %3168 = vmatpush3.bf16.xpose.msra.mxu1 %v2061_v12 }
 0x6eb   : > { %3179 = vmatprep.subr.bf16.mxu1 %v4014_v53 }
 0x7a9   : > { %v1913_v26 = vpop.f32.mrf.mxu1 }
 0x7aa   : > { %v1914_v27 = vadd.f32 %v2972_v24, %v1913_v26 }
 0x7ab   : > { %v3157_v28 = vpop.f32.mrf.mxu1 }
 0x7ac   : > { %v1920_v29 = vadd.f32 %v1914_v27, %v1472_v25 }
 0x7ad   : > { %v1916_v31 = vpop.f32.mrf.mxu1 }
 0x7ae   : > { %v1917_v32 = vadd.f32 %v2972_v24, %v1916_v31  ;;  %v1922_v33 = vsel %vm1521_vm4, %v1920_v29, 0.0 }
 0x7af   : > { %v3158_v34 = vpop.f32.mrf.mxu1  ;;  %1923 = vadd.xlane.f32.xlu0 %v1922_v33 }
 0x7b0   : > { %v1921_v35 = vadd.f32 %v1917_v32, %v1473_v30  ;;  %v2056_v32 = vld [vmem:[#allocation5] sm:$0xf] }
 0x7b1   : > { %v2129_v33 = vsel %vm2127_vm9, %v2056_v32, 0 }
 0x7b2   : > { %v1925_v36 = vsel %vm1521_vm4, %v1921_v35, 0.0 }
 0x7b3   : > { %1926 = vadd.xlane.f32.xlu0 %v1925_v36 }
 0x838   : > { %v1924_v38 = vpop.xlane.xlu0 %1923 }
 0x839   : > { %v1929_v39 = vmul.f32 0.03125, %v1924_v38 }
 0x83b   : > { %v1931_v40 = vsub.f32 %v1920_v29, %v1929_v39 }
 0x83c   : > { %v1927_v56 = vpop.xlane.xlu0 %1926 }
 0x83d   : > { %v1930_v41 = vmul.f32 0.03125, %v1927_v56  ;;  %v1933_v42 = vmul.f32 %v1931_v40, %v1931_v40 }
 0x83f   : > { %v1932_v43 = vsub.f32 %v1921_v35, %v1930_v41  ;;  %v1935_v44 = vsel %vm1521_vm4, %v1933_v42, 0.0 }
 0x840   : > { %1936 = vadd.xlane.f32.xlu0 %v1935_v44 }
 0x841   : > { %v1934_v45 = vmul.f32 %v1932_v43, %v1932_v43 }
 0x843   : > { %v1938_v46 = vsel %vm1521_vm4, %v1934_v45, 0.0 }
 0x844   : > { %1939 = vadd.xlane.f32.xlu1 %v1938_v46 }
 0x855   : > { %1972 = vperm.xlu1 %3473, %v1475_v47  }
 0x856   : > { %1967 = vperm.xlu0 %3472, %v1474_v48  }
 0x85a   : > { %2183 = vrot.lane.b32.xlu0 %v2984_v11, %s4016_s5 }
 0x8c9   : > { %v1937_v51 = vpop.xlane.xlu0 %1936 }
 0x8ca   : > { %v1941_v52 = vmul.f32 0.03125, %v1937_v51 }
 0x8cc   : > { %v1943_v54 = vadd.f32 1e-05, %v1941_v52 }
 0x8cd   : > { %v1940_v55 = vpop.xlane.xlu1 %1939 }
 0x8ce   : > { %3512 = vrsqrt.f32 %v1943_v54  ;;  %v1942_v57 = vmul.f32 0.03125, %v1940_v55 }
 0x8d0   : > { %v1944_v58 = vadd.f32 1e-05, %v1942_v57 }
 0x8d1   : > { %v4564_v4 = vpop.permute.xlu0 %1967  ;;  %v4566_v5 = vpop.permute.xlu1 %1972 }
 0x8d2   : > { %3514 = vrsqrt.f32 %v1944_v58 }
 0x8d5   : > { %v2184_v20 = vpop.permute.xlu0 %2183 }
 0x8d6   : > { %v2189_v24 = vsel %vm1587_vm5, %v2184_v20, 0 }
 0x8db   : > { %v3513_v59 = vpop.eup %3512 }
 0x8dc   : > { %v1947_v61 = vmul.f32 %v3513_v59, %v1931_v40  ;;  %v2986_v40 = vcombine.low %v2056_v32, %v2056_v32  ;;  %v2988_v32 = vld [vmem:[%s4813_s29] ss:$0 sm:$0xff]  ;;  %s4823_s29 = sld [smem:[#allocation61_spill]] }
 0x8de   : > { %v1955_v62 = vmul.f32 %v2976_v60, %v1947_v61 }
 0x8df   : > { %v3515_v63 = vpop.eup %3514 }
 0x8e0   : > { %v1948_v1 = vmul.f32 %v3515_v63, %v1932_v43  ;;  %v1963_v2 = vadd.f32 %v2977_v0, %v1955_v62 }
 0x8e2   : > { %v1956_v3 = vmul.f32 %v2976_v60, %v1948_v1  ;;  %v4569_v7 = vmul.f32 %v4564_v4, %v1963_v2  ;;  %v3487_v2 = vld [vmem:[#allocation21 + $0x8] sm:$0xff]  }
 0x8e4   : > { %v1964_v6 = vadd.f32 %v2977_v0, %v1956_v3  ;;  %v3488_v3 = vld [vmem:[#allocation21] sm:$0xff]  }
 0x8e6   : > { %v4572_v8 = vmul.f32 %v4566_v5, %v1964_v6 }
 0x8e8   : > { %v1989_v9 = vpack.c.bf16 %v4572_v8, %v4569_v7 }
 0x8ea   : > { %3164 = vmatmul.mubr.msk.bf16.vlgmr.msra.gmra.mxu0 %vm1521_vm4, %v1989_v9 }
 0x8eb   : > { %3175 = vmatprep.mubr.msk.bf16.mxu0 %vm4015_vm3, %v4014_v53  ;;  %3174 = vmatpush3.bf16.msra.mxu0 %v2129_v33 }
 0x8ec   : > { %3185 = vmatprep.subr.bf16.mxu0 %v4014_v53 }
 0x9aa   : > { %v2045_v14 = vpop.f32.mrf.mxu0 }
 0x9ab   : > { %v2046_v16 = vadd.f32 %v2978_v13, %v2045_v14 }
 0x9ac   : > { %v3165_v15 = vpop.f32.mrf.mxu0 }
 0x9ad   : > { %v2052_v21 = vmul.f32 0.25, %v2046_v16 }
 0x9ae   : > { %v2048_v17 = vpop.f32.mrf.mxu0 }
 0x9af   : > { %v2049_v18 = vadd.f32 %v2978_v13, %v2048_v17 }
 0x9b0   : > { %v3166_v19 = vpop.f32.mrf.mxu0 }
 0x9b1   : > { %v2053_v22 = vmul.f32 0.25, %v2049_v18 }
 0x9b3   : > { %v2054_v23 = vpack.c.bf16 %v2053_v22, %v2052_v21 }
 0x9b5   : > { %2178 = vrot.lane.b32.xlu0 %v2054_v23, %s4016_s5  ;;  %3170 = vmatmul.mubr.msk.bf16.vlgmr.msra.gmra.mxu1 %vm1587_vm5, %v2054_v23 }
 0x9b6   : > { %3180 = vmatpush3.bf16.xpose.msra.mxu1 %v2189_v24  ;;  %3181 = vmatprep.mubr.msk.bf16.mxu1 %vm4015_vm3, %v4014_v53 }
 0x9b7   : > { %3191 = vmatprep.subr.bf16.mxu1 %v4014_v53 }
 0xa27   : > { %v2179_v25 = vpop.permute.xlu0 %2178 }
 0xa28   : > { %3182 = vmatmul.mubr.msk.bf16.vlgmr.msra.gmra.mxu1 %vm1587_vm5, %v2179_v25 }
 0xa29   : > { %3195 = vmatprep.mubr.msk.bf16.mxu1 %vm4015_vm3, %v4014_v53  ;;  %3192 = vmatpush3.bf16.msra.mxu1 %v3487_v2  ;;  %v2993_v2 = vld [vmem:[%s4817_s18] ss:$0 sm:$0xff] }
 0xa2a   : > { %3193 = vmatprep.subr.bf16.mxu1 %v4014_v53 }
 0xa2d   : > { %3194 = vmatpush3.bf16.msra.mxu1 %v3488_v3 }
 0xa2e   : > { %3207 = vmatprep.subr.bf16.mxu1 %v4014_v53 }
 0xa75   : > { %v2097_v26 = vpop.f32.mrf.mxu1 }
 0xa76   : > { %v2105_v27 = vsel %vm2104_vm8, %v2097_v26, -inf }
 0xa77   : > { %2106 = vmax.xlane.f32.xlu1 %v2105_v27  ;;  %v3171_v28 = vpop.f32.mrf.mxu1 }
 0xa79   : > { %v2100_v29 = vpop.f32.mrf.mxu1 }
 0xa7a   : > { %v2108_v30 = vsel %vm2104_vm8, %v2100_v29, -inf }
 0xa7b   : > { %2109 = vmax.xlane.f32.xlu0 %v2108_v30  ;;  %v3172_v31 = vpop.f32.mrf.mxu1 }
 0xae8   : > { %v2225_v34 = vpop.f32.mrf.mxu1 }
 0xae9   : > { %v2232_v35 = vsel %vm2104_vm8, %v2225_v34, -inf }
 0xaea   : > { %2233 = vmax.xlane.f32.xlu0 %v2232_v35  ;;  %v3183_v36 = vpop.f32.mrf.mxu1 }
 0xaec   : > { %v2228_v37 = vpop.f32.mrf.mxu1 }
 0xaed   : > { %v2235_v38 = vsel %vm2104_vm8, %v2228_v37, -inf }
 0xaee   : > { %2236 = vmax.xlane.f32.xlu1 %v2235_v38  ;;  %v3184_v39 = vpop.f32.mrf.mxu1 }
 0xb00   : > { %v2107_v56 = vpop.xlane.xlu1 %2106  ;;  %2254 = vrot.lane.b32.xlu0 %v2986_v40, %s4016_s5  ;;  %s4819_s5 = sld [smem:[#allocation58_spill]] }
 0xb01   : > { %v2111_v41 = vsub.f32 %v2097_v26, %v2107_v56 }
 0xb03   : > { %v2113_v42 = vmul.f32 1.442695, %v2111_v41 }
 0xb04   : > { %v2110_v43 = vpop.xlane.xlu0 %2109 }
 0xb05   : > { %v2112_v44 = vsub.f32 %v2100_v29, %v2110_v43  ;;  %3516 = vpow2.f32 %v2113_v42 }
 0xb07   : > { %v2115_v45 = vmul.f32 1.442695, %v2112_v44 }
 0xb09   : > { %3518 = vpow2.f32 %v2115_v45 }
 0xb12   : > { %v3517_v46 = vpop.eup %3516 }
 0xb13   : > { %v2117_v0 = vsel %vm2104_vm8, %v3517_v46, 0.0 }
 0xb16   : > { %v3519_v47 = vpop.eup %3518 }
 0xb17   : > { %v2123_v48 = vpack.c.bf16 %v3519_v47, %v3517_v46  ;;  %v2120_v1 = vsel %vm2104_vm8, %v3519_v47, 0.0 }
 0xb19   : > { %3176 = vmatmul.mubr.msk.bf16.vlgmr.msra.gmra.mxu0 %vm2104_vm8, %v2123_v48 }
 0xb1a   : > { %3187 = vmatprep.mubr.msk.bf16.mxu0 %vm4015_vm3, %v4014_v53 }
 0xb73   : > { %v2234_v49 = vpop.xlane.xlu0 %2233 }
 0xb74   : > { %v2238_v50 = vsub.f32 %v2225_v34, %v2234_v49 }
 0xb76   : > { %v2240_v51 = vmul.f32 1.442695, %v2238_v50 }
 0xb77   : > { %v2237_v52 = vpop.xlane.xlu1 %2236  ;;  %v2255_v54 = vpop.permute.xlu0 %2254 }
 0xb78   : > { %3520 = vpow2.f32 %v2240_v51  ;;  %v2239_v55 = vsub.f32 %v2228_v37, %v2237_v52  ;;  %v2260_v57 = vsel %vm2127_vm9, %v2255_v54, 0  ;;  %v3489_v51 = vld [vmem:[#allocation23 + $0x8] sm:$0xff]   ;;  %v3491_v52 = vld [vmem:[%s4814_s15 + $0x18] sm:$0xff]   ;;  %s3010_s15 = sshll.u32 %s4822_s9, 2  ;;  %s4019_s9 = smov [#allocation24]  }
 0xb79   : > { %3186 = vmatpush3.bf16.msra.mxu0 %v2260_v57 }
 0xb7a   : > { %v2242_v58 = vmul.f32 1.442695, %v2239_v55  ;;  %3199 = vmatprep.subr.bf16.mxu0 %v4014_v53 }
 0xb7c   : > { %3522 = vpow2.f32 %v2242_v58 }
 0xb85   : > { %v3521_v59 = vpop.eup %3520 }
 0xb86   : > { %v2244_v60 = vsel %vm2104_vm8, %v3521_v59, 0.0 }
 0xb87   : > { %2245 = vadd.xlane.f32.xlu1 %v2244_v60 }
 0xb89   : > { %v3523_v61 = vpop.eup %3522 }
 0xb8a   : > { %v2247_v62 = vsel %vm2104_vm8, %v3523_v61, 0.0  ;;  %v2250_v63 = vpack.c.bf16 %v3523_v61, %v3521_v59 }
 0xb8b   : > { %2248 = vadd.xlane.f32.xlu1 %v2247_v62  ;;  %v2992_v62 = vld [vmem:[%s4816_s19] ss:$0 sm:$0xff]  ;;  %s2648_s19 = sadd.s32 %s3010_s15, %s4432_s22  ;;  %s4824_s22 = sand.u32 1, %s3932_s10  }
 0xb8c   : > { %3188 = vmatmul.mubr.msk.bf16.vlgmr.msra.gmra.mxu0 %vm2104_vm8, %v2250_v63  ;;  %s3011_s18 = sshll.u32 %s2648_s19, 6  ;;  %s3832_s15 = sshll.u32 %s4019_s9, 4  ;;  %s3833_s15 = int_to_ptr.vmem [resolvable:$false] %s3832_s15 }
 0xb8d   : > { %3203 = vmatprep.mubr.msk.bf16.mxu0 %vm4015_vm3, %v4014_v53  ;;  %3200 = vmatpush3.bf16.msra.mxu0 %v3489_v51  ;;  %s3834_s19 = scalar_lea.vmem %s3833_s15, 256 }
 0xb8e   : > { %3201 = vmatprep.subr.bf16.mxu0 %v4014_v53 }
 0xb8f   : > { %2118 = vadd.xlane.f32.xlu1 %v2117_v0 }
 0xb93   : > { %2121 = vadd.xlane.f32.xlu1 %v2120_v1 }
 0xbd9   : > { %v2165_v6 = vpop.f32.mrf.mxu0 }
 0xbdb   : > { %v3177_v9 = vpop.f32.mrf.mxu0 }
 0xbdd   : > { %v2168_v10 = vpop.f32.mrf.mxu0 }
 0xbdf   : > { %v3178_v11 = vpop.f32.mrf.mxu0 }
 0xc10   : > { %v2246_v12 = vpop.xlane.xlu1 %2245 }
 0xc11   : > { %3524 = vrcp.f32 %v2246_v12 }
 0xc14   : > { %v2249_v13 = vpop.xlane.xlu1 %2248 }
 0xc15   : > { %3526 = vrcp.f32 %v2249_v13 }
 0xc18   : > { %v2119_v23 = vpop.xlane.xlu1 %2118 }
 0xc1c   : > { %v2122_v24 = vpop.xlane.xlu1 %2121 }
 0xc1d   : > { %3528 = vrcp.f32 %v2122_v24 }
 0xc1e   : > { %v3525_v16 = vpop.eup %3524  ;;  %3530 = vrcp.f32 %v2119_v23 }
 0xc22   : > { %v3527_v17 = vpop.eup %3526 }
 0xc2a   : > { %v3529_v25 = vpop.eup %3528 }
 0xc2b   : > { %v3531_v26 = vpop.eup %3530  ;;  %v2175_v27 = vmul.f32 %v3529_v25, %v2168_v10 }
 0xc2c   : > { %v2174_v28 = vmul.f32 %v3531_v26, %v2165_v6 }
 0xc2e   : > { %v2176_v29 = vpack.c.bf16 %v2175_v27, %v2174_v28  ;;  %v2998_v27 = vld [vmem:[%s4819_s5] ss:$0 sm:$0xff]  ;;  %s4652_s5 = scalar_lea.hbm %s4823_s29, %s3011_s18 }
 0xc4c   : > { %v2296_v14 = vpop.f32.mrf.mxu0 }
 0xc4d   : > { %v2305_v19 = vmul.f32 %v3525_v16, %v2296_v14  ;;  %v3492_v14 = vld [vmem:[%s4815_s17 + $0x10] sm:$0xff]   ;;  %v3494_v16 = vld [vmem:[%s4815_s17] sm:$0xff]  }
 0xc4e   : > { %v3189_v15 = vpop.f32.mrf.mxu0 }
 0xc4f   : > { %v3493_v15 = vld [vmem:[%s4815_s17 + $0x8] sm:$0xff]  }
 0xc50   : > { %v2299_v18 = vpop.f32.mrf.mxu0 }
 0xc51   : > { %v2306_v20 = vmul.f32 %v3527_v17, %v2299_v18  ;;  %v2994_v17 = vld [vmem:[%s4818_s2] ss:$0 sm:$0xff]  ;;  %s2651_s2 = sshll.u32 %s4444_s30, 4  ;;  %s4654_s2 = int_to_ptr.vmem [resolvable:$true] %s2651_s2 }
 0xc52   : > { %v3190_v21 = vpop.f32.mrf.mxu0  ;;  %p3835_p8 = scmp.lt.s32.totalorder %s4654_s2, %s3833_s15 }
 0xc53   : > { %v2307_v22 = vpack.c.bf16 %v2306_v20, %v2305_v19 }
 0xc55   : > { %2309 = vrot.lane.b32.xlu1 %v2307_v22, %s4017_s24  ;;  %s4821_s24 = sld [smem:[#allocation60_spill]] }
 0xcc7   : > { %v2310_v30 = vpop.permute.xlu1 %2309 }
 0xcc8   : > { %v2313_v31 = vsel %vm1587_vm5, %v2176_v29, %v2310_v30 }
 0xcc9   : > { %3196 = vmatmul.mubr.msk.bf16.vlgmr.msra.gmra.mxu1 %vm1521_vm4, %v2313_v31 }
 0xcca   : > { %3215 = vmatprep.mubr.msk.bf16.mxu1 %vm4015_vm3, %v4014_v53  ;;  %3208 = vmatpush3.bf16.msra.mxu1 %v3491_v52 }
 0xccb   : > { %3209 = vmatprep.subr.bf16.mxu1 %v4014_v53 }
 0xcce   : > { %3210 = vmatpush3.bf16.msra.mxu1 %v3492_v14 }
 0xccf   : > { %3211 = vmatprep.subr.bf16.mxu1 %v4014_v53 }
 0xcd2   : > { %3212 = vmatpush3.bf16.msra.mxu1 %v3493_v15 }
 0xcd3   : > { %3213 = vmatprep.subr.bf16.mxu1 %v4014_v53 }
 0xcd6   : > { %3214 = vmatpush3.bf16.msra.mxu1 %v3494_v16 }
 0xd89   : > { %v2368_v33 = vpop.f32.mrf.mxu1 }
 0xd8a   : > { %v2369_v34 = vadd.f32 %v2988_v32, %v2368_v33 }
 0xd8b   : > { %v3197_v35 = vpop.f32.mrf.mxu1 }
 0xd8c   : > { %v2375_v36 = vadd.f32 %v2369_v34, %v4569_v7 }
 0xd8d   : > { %v2371_v37 = vpop.f32.mrf.mxu1 }
 0xd8e   : > { %v2372_v38 = vadd.f32 %v2988_v32, %v2371_v37  ;;  %v2377_v39 = vsel %vm1521_vm4, %v2375_v36, 0.0 }
 0xd8f   : > { %2378 = vadd.xlane.f32.xlu0 %v2377_v39  ;;  %v3198_v40 = vpop.f32.mrf.mxu1 }
 0xd90   : > { %v2376_v56 = vadd.f32 %v2372_v38, %v4572_v8  ;;  %v3490_v8 = vld [vmem:[#allocation23] sm:$0xff]  }
 0xd91   : > { %3202 = vmatpush3.bf16.msra.mxu0 %v3490_v8  ;;  %v3004_v8 = vld [vmem:[%s4820_s20] ss:$0 sm:$0xff]  ;;  %s4659_s20 = scalar_lea.sflag [#allocation8], %s4824_s22 }
 0xd92   : > { %v2380_v41 = vsel %vm1521_vm4, %v2376_v56, 0.0 }
 0xd93   : > { %2381 = vadd.xlane.f32.xlu1 %v2380_v41 }
 0xe18   : > { %v2379_v42 = vpop.xlane.xlu0 %2378 }
 0xe19   : > { %v2383_v43 = vmul.f32 0.03125, %v2379_v42 }
 0xe1b   : > { %v2385_v44 = vsub.f32 %v2375_v36, %v2383_v43 }
 0xe1c   : > { %v2382_v45 = vpop.xlane.xlu1 %2381 }
 0xe1d   : > { %v2384_v46 = vmul.f32 0.03125, %v2382_v45  ;;  %v2387_v47 = vmul.f32 %v2385_v44, %v2385_v44 }
 0xe1f   : > { %v2386_v48 = vsub.f32 %v2376_v56, %v2384_v46  ;;  %v2389_v7 = vsel %vm1521_vm4, %v2387_v47, 0.0 }
 0xe20   : > { %2390 = vadd.xlane.f32.xlu0 %v2389_v7 }
 0xe21   : > { %v2388_v49 = vmul.f32 %v2386_v48, %v2386_v48 }
 0xe23   : > { %v2392_v50 = vsel %vm1521_vm4, %v2388_v49, 0.0 }
 0xe24   : > { %2393 = vadd.xlane.f32.xlu0 %v2392_v50 }
 0xea9   : > { %v2391_v54 = vpop.xlane.xlu0 %2390 }
 0xeaa   : > { %v2395_v55 = vmul.f32 0.03125, %v2391_v54  ;;  %v3005_v54 = vld [vmem:[%s4821_s24] ss:$0 sm:$0xff]  ;;  %s3828_s24 = scalar_lea.vmem %s4654_s2, 128 }
 0xeab   : > { %p3829_p3 = scmp.ne.s32.totalorder %s4654_s2, %s3828_s24  ;;  %p3836_p2 = scmp.lt.s32.totalorder %s3834_s19, %s3828_s24 }
 0xeac   : > { %v2397_v57 = vadd.f32 1e-05, %v2395_v55 }
 0xead   : > { %v2394_v58 = vpop.xlane.xlu0 %2393  ;;  %p3830_p0 = pnand %p3829_p3, %p4825_p13  ;;  %p3837_p5 = por %p3836_p2, %p3835_p8 }
 0xeae   : > { %3532 = vrsqrt.f32 %v2397_v57  ;;  %v2396_v59 = vmul.f32 0.03125, %v2394_v58 }
 0xeaf   : > { %p3831_p6 = pneg %p3830_p0 }
 0xeb0   : > { %v2398_v60 = vadd.f32 1e-05, %v2396_v59 }
 0xeb1   : > { %p3838_p11 = pnand %p3837_p5, %p3831_p6 }
 0xeb2   : > { %3534 = vrsqrt.f32 %v2398_v60 }
 0xebb   : > { %v3533_v61 = vpop.eup %3532 }
 0xebc   : > { %v2401_v63 = vmul.f32 %v3533_v61, %v2385_v44 }
 0xebe   : > { %v2409_v0 = vmul.f32 %v2992_v62, %v2401_v63 }
 0xebf   : > { %v3535_v1 = vpop.eup %3534 }
 0xec0   : > { %v2402_v3 = vmul.f32 %v3535_v1, %v2386_v48  ;;  %v2417_v9 = vadd.f32 %v2993_v2, %v2409_v0 }
 0xec2   : > { %v2410_v6 = vmul.f32 %v2992_v62, %v2402_v3  ;;  %v2419_v11 = vmul.f32 %v2417_v9, %v4564_v4 }
 0xec4   : > { %v2418_v10 = vadd.f32 %v2993_v2, %v2410_v6 }
 0xec6   : > { %v2420_v12 = vmul.f32 %v2418_v10, %v4566_v5 }
 0xec8   : > { %v2421_v13 = vpack.c.bf16 %v2420_v12, %v2419_v11 }
 0xeca   : > { %3204 = vmatmul.mubr.msk.bf16.vlgmr.msra.gmra.mxu0 %vm1521_vm4, %v2421_v13 }
 0xf8a   : > { %v2482_v18 = vpop.f32.mrf.mxu0 }
 0xf8b   : > { %v2483_v20 = vadd.f32 %v2994_v17, %v2482_v18 }
 0xf8c   : > { %v3205_v19 = vpop.f32.mrf.mxu0 }
 0xf8d   : > { %v2489_v24 = vmax.f32 %v2483_v20, 0.0 }
 0xf8e   : > { %v2485_v21 = vpop.f32.mrf.mxu0 }
 0xf8f   : > { %v2486_v22 = vadd.f32 %v2994_v17, %v2485_v21 }
 0xf90   : > { %v3206_v23 = vpop.f32.mrf.mxu0 }
 0xf91   : > { %v2490_v25 = vmax.f32 %v2486_v22, 0.0 }
 0xf93   : > { %v2491_v26 = vpack.c.bf16 %v2490_v25, %v2489_v24 }
 0xf95   : > { %3216 = vmatmul.mubr.msk.bf16.vlgmr.msra.gmra.mxu1 %vm2531_vm10, %v2491_v26 }
0x1055   : > { %v2569_v28 = vpop.f32.mrf.mxu1 }
0x1056   : > { %v2570_v29 = vadd.f32 %v2998_v27, %v2569_v28 }
0x1057   : > { %v3217_v30 = vpop.f32.mrf.mxu1 }
0x1058   : > { %v2576_v31 = vadd.f32 %v2570_v29, %v2419_v11 }
0x1059   : > { %v2572_v53 = vpop.f32.mrf.mxu1 }
0x105a   : > { %v2573_v32 = vadd.f32 %v2998_v27, %v2572_v53  ;;  %v2580_v33 = vsel %vm1521_vm4, %v2576_v31, 0.0 }
0x105b   : > { %2581 = vadd.xlane.f32.xlu0 %v2580_v33  ;;  %v3218_v34 = vpop.f32.mrf.mxu1 }
0x105c   : > { %v2577_v35 = vadd.f32 %v2573_v32, %v2420_v12 }
0x105e   : > { %v2583_v36 = vsel %vm1521_vm4, %v2577_v35, 0.0 }
0x105f   : > { %2584 = vadd.xlane.f32.xlu0 %v2583_v36 }
0x10e4   : > { %v2582_v37 = vpop.xlane.xlu0 %2581 }
0x10e5   : > { %v2586_v38 = vmul.f32 0.03125, %v2582_v37 }
0x10e7   : > { %v2588_v39 = vsub.f32 %v2576_v31, %v2586_v38 }
0x10e8   : > { %v2585_v40 = vpop.xlane.xlu0 %2584 }
0x10e9   : > { %v2587_v56 = vmul.f32 0.03125, %v2585_v40  ;;  %v2590_v41 = vmul.f32 %v2588_v39, %v2588_v39 }
0x10eb   : > { %v2589_v42 = vsub.f32 %v2577_v35, %v2587_v56  ;;  %v2592_v43 = vsel %vm1521_vm4, %v2590_v41, 0.0 }
0x10ec   : > { %2593 = vadd.xlane.f32.xlu0 %v2592_v43 }
0x10ed   : > { %v2591_v44 = vmul.f32 %v2589_v42, %v2589_v42 }
0x10ef   : > { %v2595_v45 = vsel %vm1521_vm4, %v2591_v44, 0.0 }
0x10f0   : > { %2596 = vadd.xlane.f32.xlu1 %v2595_v45 }
0x1175   : > { %v2594_v46 = vpop.xlane.xlu0 %2593 }
0x1176   : > { %v2598_v47 = vmul.f32 0.03125, %v2594_v46 }
0x1178   : > { %v2600_v48 = vadd.f32 1e-05, %v2598_v47 }
0x1179   : > { %v2597_v7 = vpop.xlane.xlu1 %2596 }
0x117a   : > { %3536 = vrsqrt.f32 %v2600_v48  ;;  %v2599_v49 = vmul.f32 0.03125, %v2597_v7 }
0x117c   : > { %v2601_v50 = vadd.f32 1e-05, %v2599_v49 }
0x117e   : > { %3538 = vrsqrt.f32 %v2601_v50 }
0x1187   : > { %v3537_v51 = vpop.eup %3536 }
0x1188   : > { %v2604_v52 = vmul.f32 %v3537_v51, %v2588_v39 }
0x118a   : > { %v2612_v55 = vmul.f32 %v3004_v8, %v2604_v52 }
0x118b   : > { %v3539_v57 = vpop.eup %3538 }
0x118c   : > { %v2605_v58 = vmul.f32 %v3539_v57, %v2589_v42  ;;  %v2620_v59 = vadd.f32 %v3005_v54, %v2612_v55 }
0x118e   : > { %v2613_v60 = vmul.f32 %v3004_v8, %v2605_v58  ;;  %v2622_v61 = vmul.f32 %v2620_v59, %v4564_v4 }
0x1190   : > { %v2621_v62 = vadd.f32 %v3005_v54, %v2613_v60  ;;  %v3023_v63 = vpack.c.bf16 %v2622_v61, %v2622_v61 }
0x1192   : > { %v2623_v0 = vmul.f32 %v2621_v62, %v4566_v5  ;;  %2633 = vst.msk [vmem:[%s4444_s30] sm:$0xf] %vm2632_vm11, %v3023_v63 }
0x1194   : > { %v3024_v1 = vpack.c.bf16 %v2623_v0, %v2623_v0 }
0x1196   : > { %2634 = vst.msk [vmem:[%s4444_s30 + $0x4] sm:$0xf] %vm2632_vm11, %v3024_v1 }
0x1197   : > { %3841 = shalt.err (!%p3838_p11)
}
0x1198   : > { %s3842_s30 = scalar_lea.hbm %s4652_s5, 128  ;;  %s3846_s18 = scalar_lea.hbm %s4823_s29, 512 }
0x1199   : > { %p3843_p12 = scmp.ne.s32.totalorder %s4652_s5, %s3842_s30  ;;  %p3847_p1 = scmp.lt.s32.totalorder %s4652_s5, %s4823_s29 }
0x119a   : > { %p3848_p4 = scmp.lt.s32.totalorder %s3846_s18, %s3842_s30 }
0x119b   : > { %p3844_p9 = pnand %p3843_p12, %p4825_p13 }
0x119c   : > { %p3849_p7 = por %p3848_p4, %p3847_p1 }
0x119d   : > { %p3845_p10 = pneg %p3844_p9 }
0x119f   : > { %p3850_p3 = pnand %p3849_p7, %p3845_p10 }
0x11a1   : > { %3853 = shalt.err (!%p3850_p3)
}
0x11a2   : > { %s4020_s22 = smov 64   ;;  %s4021_s24 = smov 4  }
0x11a3   : > { %3261 = dma.vmem_to_hbm [thread:$0]  (%p4825_p13), %s4654_s2, 128, %s4652_s5, %s4659_s20, %s4020_s22, %s4020_s22, %s4021_s24  }
0x11a4 PF: > { %p3323_p0 = scmp.ge.s32.totalorder %s3968_s28, 2  ;;  %s2666_s9 = sand.u32 1, %s3928_s7  }
0x11a5   : > { %p4826_p6 = scmp.ne.s32.totalorder %s4792_s8, 0  ;;  %s2667_s15 = scalar_lea.sflag [#allocation8], %s2666_s9 }
0x11a7   : > { %p3299_p8 = pnand %p3323_p0, %p4826_p6 }
0x11a9   : > { %p3300_p2 = pneg %p3299_p8 }
0x11ab   : > { %3923 = dma.done.wait (%p3300_p2), %s2667_s15, 128  }
0x11ac   : > { %3925 = vsyncadd (%p3300_p2), %s2667_s15, 4294967168  ;;  %s80_s28 = sadd.s32 1, %s3968_s28   ;;  %s4827_s4 = sld [smem:[#allocation64_spill]] }
0x11ad   : > { %p77_p5 = scmp.ge.s32.totalorder %s80_s28, 6   ;;  %s4828_s7 = smov %s3932_s10 }
0x11ae   : > { %s4829_s10 = smov %s3936_s11  ;;  %s4830_s11 = smov %s4367_s12 }
0x11af   : > { %s4831_s15 = smov %s3944_s16  ;;  %s4832_s16 = smov %s3948_s0 }
0x11b0   : > { %s4833_s0 = smov %s4364_s6  ;;  %s4834_s18 = smov %s3960_s23 }
0x11b1   : > { %s4835_s22 = smov %s3964_s26  ;;  %s4836_s23 = smov %s4839_s1 }
0x11b2   : > { %s4837_s26 = smov %s4827_s4  ;;  %79 = sbr.rel (!%p77_p5) target bundleno = 81 (0x51), region = 261 }
0x11b7   :  { %2672 = vsyncpa [#allocation7], 1 }
0x11b8   :  { %2674 = vsyncpa [#allocation7 + $0x1], 1 }
0x11b9   :  { %2675 = vsyncpa [#allocation10], 1 }
0x11ba   :  { %2676 = vsyncpa [#allocation13], 1 }
0x11bb   :  { %2677 = vsyncpa [#allocation16], 1 }
0x11bc   :  { %2678 = vsyncpa [#allocation19], 1 }
0x11bd   :  { %2679 = vsyncpa [#allocation22], 1 }
0x11be   :  { %2680 = vsyncpa [#allocation8], 1 }
0x11bf   :  { %2682 = vsyncpa [#allocation8 + $0x1], 1 }

</bundles_post_ra>
